<compile_context>
chip_gen: v5e
topology: v5e:2x2
jax: 0.10.0
libtpu: 0.0.40
codegen_flags: <defaults>
</compile_context>

<pallas_src>
import functools

import jax
import jax.numpy as jnp
from jax import lax
from jax.experimental import pallas as pl
from jax.experimental.pallas import tpu as pltpu


def _round_up(v, m):
    return ((v + m - 1) // m) * m


def _pick_h_tile(H, row_bytes, budget=6 << 20):
    """Largest row-tile that divides H and fits the per-block VMEM budget,
    preferring >= 2 tiles (pipeline overlap / v7x megacore balance)."""
    cands = [t for t in range(1, H + 1)
             if H % t == 0 and t * row_bytes <= budget]
    if not cands:
        return 1
    th = max(cands)
    if th == H and H > 1:
        smaller = [t for t in cands if t < H]
        if smaller:
            th = max(smaller)
    return th


def _fold_bn(bn, eps):
    s = bn["g"] * jax.lax.rsqrt(bn["v"] + eps)
    t = bn["b"] - bn["m"] * s
    return s.astype(jnp.float32), t.astype(jnp.float32)


# ----------------------------------------------------------------------------
# Fused Bottleneck kernel
# ----------------------------------------------------------------------------
def _bottleneck_kernel(*refs, W, has_downsample):
    if has_downsample:
        (x_ref, xtop_ref, xbot_ref,
         w1_ref, s1_ref, t1_ref,
         w2_ref, s2_ref, t2_ref,
         w3_ref, s3_ref, t3_ref,
         wd_ref, sd_ref, td_ref, o_ref) = refs
    else:
        (x_ref, xtop_ref, xbot_ref,
         w1_ref, s1_ref, t1_ref,
         w2_ref, s2_ref, t2_ref,
         w3_ref, s3_ref, t3_ref, o_ref) = refs

    _, th, Wq, Cin = x_ref.shape
    C1 = w1_ref.shape[1]
    C3 = o_ref.shape[-1]
    hi = pl.program_id(1)
    Htot = pl.num_programs(1) * th

    # --- conv1 (1x1) + BN1 + ReLU over the tile plus its 1-row halos --------
    x_all = jnp.concatenate([xtop_ref[0], x_ref[0], xbot_ref[0]], axis=0)
    xb = x_all.reshape((th + 2) * Wq, Cin).astype(jnp.bfloat16)
    y1 = jnp.dot(xb, w1_ref[...], preferred_element_type=jnp.float32)
    y1 = jnp.maximum(y1 * s1_ref[...] + t1_ref[...], 0.0)
    y1 = y1.reshape(th + 2, Wq, C1)

    # conv2's zero padding applies to y1: zero out-of-image rows / pad columns
    # (the wrapper's zero rows/cols of x would otherwise give relu(t1) != 0).
    ri = lax.broadcasted_iota(jnp.int32, (th + 2, Wq, C1), 0)
    ci = lax.broadcasted_iota(jnp.int32, (th + 2, Wq, C1), 1)
    g = hi * th + ri - 1                       # global y1 row of buffer row ri
    y1 = jnp.where((g >= 0) & (g < Htot) & (ci < W), y1, 0.0)

    # --- conv2 (3x3, pad 1) + BN2 + ReLU as one K = 9*C1 MXU matmul ---------
    zcol = jnp.zeros((th + 2, 1, C1), jnp.float32)
    sh_l = jnp.concatenate([zcol, y1[:, :Wq - 1, :]], axis=1)   # [w] = y1[w-1]
    sh_r = jnp.concatenate([y1[:, 1:, :], zcol], axis=1)        # [w] = y1[w+1]
    shifts = (sh_l, y1, sh_r)                                   # kw = 0, 1, 2
    taps = [shifts[kw][kh:kh + th] for kh in range(3) for kw in range(3)]
    x9 = jnp.concatenate(taps, axis=-1)                         # (th, Wq, 9*C1)
    x9 = x9.astype(jnp.bfloat16).reshape(th * Wq, 9 * C1)
    y2 = jnp.dot(x9, w2_ref[...], preferred_element_type=jnp.float32)
    y2 = jnp.maximum(y2 * s2_ref[...] + t2_ref[...], 0.0)

    # --- conv3 (1x1) + BN3 ---------------------------------------------------
    y3 = jnp.dot(y2.astype(jnp.bfloat16), w3_ref[...],
                 preferred_element_type=jnp.float32)
    y3 = y3 * s3_ref[...] + t3_ref[...]

    # --- residual branch + final ReLU ----------------------------------------
    if has_downsample:
        xm = xb[Wq:(th + 1) * Wq]              # main-tile rows (bf16, aligned)
        res = jnp.dot(xm, wd_ref[...], preferred_element_type=jnp.float32)
        res = res * sd_ref[...] + td_ref[...]
    else:
        res = x_ref[0].reshape(th * Wq, C3).astype(jnp.float32)
    out = jnp.maximum(y3 + res, 0.0)
    o_ref[0] = out.reshape(th, Wq, C3).astype(o_ref.dtype)


# ----------------------------------------------------------------------------
# Wrapper: full Bottleneck forward (NCHW in / NCHW out)
# ----------------------------------------------------------------------------
def bottleneck_forward(x_nchw, params, *, stride=1, eps=1e-5):
    if stride != 1:
        raise NotImplementedError("TODO(synk): stride > 1 not implemented")
    B, Cin, H, W = x_nchw.shape
    C1 = params["w1"].shape[1]
    C2 = params["w2"].shape[3]
    C3 = params["w3"].shape[1]
    ds = params.get("downsample")
    has_ds = ds is not None
    if not has_ds:
        assert Cin == C3, "identity residual needs in_planes == expansion*planes"

    s1, t1 = _fold_bn(params["bn1"], eps)
    s2, t2 = _fold_bn(params["bn2"], eps)
    s3, t3 = _fold_bn(params["bn3"], eps)
    w2cat = params["w2"].reshape(9 * C1, C2)   # K index = (kh*3 + kw)*C1 + ci

    # NHWC; single x stream (f32 for exact identity skip, bf16 if downsample).
    x = jnp.transpose(x_nchw, (0, 2, 3, 1)).astype(jnp.float32)
    x_dt = jnp.bfloat16 if has_ds else jnp.float32
    x = x.astype(x_dt)

    Wq = _round_up(W + 1, 8)                   # >= 1 zero column on the right
    x = jnp.pad(x, ((0, 0), (0, 0), (0, Wq - W), (0, 0)))

    bx = x.dtype.itemsize
    row_bytes = Wq * (2 * Cin * bx + 2 * C3 * 4
                      + C1 * 16 + 9 * C1 * 8 + C2 * 8 + C3 * 12)
    th = _pick_h_tile(H, row_bytes)
    assert H % th == 0
    nH = H // th

    # 1-row halos above/below every H-tile (zero rows at the image boundary).
    xp = jnp.pad(x, ((0, 0), (1, 1), (0, 0), (0, 0)))
    x_top = xp[:, ::th][:, :nH]                # x row i*th - 1   (or zeros)
    x_bot = xp[:, th + 1::th][:, :nH]          # x row i*th + th  (or zeros)

    # VMEM budget: double-buffered blocks + weights + in-kernel temporaries.
    blk_bytes = th * Wq * (Cin * bx + C3 * 4) + 2 * Wq * Cin * bx
    w_bytes = 2 * (Cin * C1 + 9 * C1 * C2 + C2 * C3
                   + (Cin * C3 if has_ds else 0))
    w_bytes += 8 * (C1 + C2 + C3 + (C3 if has_ds else 0))
    tmp_bytes = ((th + 2) * Wq * (Cin * 2 + C1 * 8)
                 + th * Wq * (9 * C1 * 6 + C2 * 8 + C3 * 12))
    vmem_limit = int(min(max(2 * (blk_bytes + w_bytes) + tmp_bytes + (4 << 20),
                             32 << 20), 56 << 20))

    def _rep(shape):
        return pl.BlockSpec(shape, lambda b, i: (0, 0))

    in_specs = [
        pl.BlockSpec((1, th, Wq, Cin), lambda b, i: (b, i, 0, 0)),
        pl.BlockSpec((1, 1, Wq, Cin), lambda b, i: (b, i, 0, 0)),
        pl.BlockSpec((1, 1, Wq, Cin), lambda b, i: (b, i, 0, 0)),
        _rep((Cin, C1)), _rep((1, C1)), _rep((1, C1)),
        _rep((9 * C1, C2)), _rep((1, C2)), _rep((1, C2)),
        _rep((C2, C3)), _rep((1, C3)), _rep((1, C3)),
    ]
    args = [x, x_top, x_bot,
            params["w1"], s1.reshape(1, C1), t1.reshape(1, C1),
            w2cat, s2.reshape(1, C2), t2.reshape(1, C2),
            params["w3"], s3.reshape(1, C3), t3.reshape(1, C3)]
    if has_ds:
        sd, td = _fold_bn(ds["bn"], eps)
        in_specs += [_rep((Cin, C3)), _rep((1, C3)), _rep((1, C3))]
        args += [ds["w"], sd.reshape(1, C3), td.reshape(1, C3)]

    out = pl.pallas_call(
        functools.partial(_bottleneck_kernel, W=W, has_downsample=has_ds),
        out_shape=jax.ShapeDtypeStruct((B, H, Wq, C3), jnp.float32),
        grid=(B, nH),
        in_specs=in_specs,
        out_specs=pl.BlockSpec((1, th, Wq, C3), lambda b, i: (b, i, 0, 0)),
        compiler_params=pltpu.CompilerParams(
            dimension_semantics=("parallel", "parallel"),
            vmem_limit_bytes=vmem_limit),
    )(*args)

    out = out[:, :, :W, :]                     # drop the width pad columns
    return jnp.transpose(out, (0, 3, 1, 2))    # back to NCHW


# ----------------------------------------------------------------------------
# Pure-jnp reference (mirrors the kernel's bf16 / f32 precision choices)
# ----------------------------------------------------------------------------
def bottleneck_ref(x_nchw, params, eps=1e-5):
    x = jnp.transpose(x_nchw, (0, 2, 3, 1)).astype(jnp.float32)
    _, H, W, _ = x.shape
    hi = jax.lax.Precision.HIGHEST

    def mm(a, w):  # bf16 operands, f32 accumulation
        a = a.astype(jnp.bfloat16).astype(jnp.float32)
        return jnp.einsum("bhwc,cd->bhwd", a, w.astype(jnp.float32), precision=hi)

    s1, t1 = _fold_bn(params["bn1"], eps)
    s2, t2 = _fold_bn(params["bn2"], eps)
    s3, t3 = _fold_bn(params["bn3"], eps)

    y1 = jnp.maximum(mm(x, params["w1"]) * s1 + t1, 0.0)
    y1 = y1.astype(jnp.bfloat16).astype(jnp.float32)   # kernel uses bf16 taps

    w2 = params["w2"].astype(jnp.float32)
    y1p = jnp.pad(y1, ((0, 0), (1, 1), (1, 1), (0, 0)))
    acc = jnp.zeros(y1.shape[:3] + (w2.shape[3],), jnp.float32)
    for kh in range(3):
        for kw in range(3):
            acc = acc + jnp.einsum("bhwc,cd->bhwd",
                                   y1p[:, kh:kh + H, kw:kw + W, :], w2[kh, kw],
                                   precision=hi)
    y2 = jnp.maximum(acc * s2 + t2, 0.0)
    y3 = mm(y2, params["w3"]) * s3 + t3

    if params.get("downsample") is not None:
        ds = params["downsample"]
        sd, td = _fold_bn(ds["bn"], eps)
        residual = mm(x, ds["w"]) * sd + td
    else:
        residual = x
    out = jnp.maximum(y3 + residual, 0.0)
    return jnp.transpose(out, (0, 3, 1, 2))


# ----------------------------------------------------------------------------
# Deterministic parameter initialization (shapes follow Bottleneck.__init__)
# ----------------------------------------------------------------------------
def init_params(key, in_planes, planes, expansion=4):
    ks = jax.random.split(key, 24)
    it = iter(ks)

    def w(shape, scale=0.1):
        return (scale * jax.random.normal(next(it), shape, jnp.float32)
                ).astype(jnp.bfloat16)

    def bn(c):
        return dict(
            g=1.0 + 0.1 * jax.random.normal(next(it), (c,), jnp.float32),
            b=0.1 * jax.random.normal(next(it), (c,), jnp.float32),
            m=0.1 * jax.random.normal(next(it), (c,), jnp.float32),
            v=jax.random.uniform(next(it), (c,), jnp.float32,
                                 minval=0.5, maxval=1.5),
        )

    cout = expansion * planes
    p = dict(
        # PyTorch Conv2d weights (Cout, Cin, kH, kW) are stored transposed to
        # (Cin, Cout) / HWIO so channels sit on the TPU lane axis.
        w1=w((in_planes, planes)), bn1=bn(planes),
        w2=w((3, 3, planes, planes)), bn2=bn(planes),
        w3=w((planes, cout)), bn3=bn(cout),
        downsample=None,
    )
    if in_planes != cout:
        p["downsample"] = dict(w=w((in_planes, cout)), bn=bn(cout))
    return p


if __name__ == "__main__":
    key = jax.random.PRNGKey(0)
    k1, k2, k3, k4 = jax.random.split(key, 4)

    H, W, expansion = 16, 14, 4                 # W deliberately not 8-aligned

    # --- Config 1: module defaults (downsample=None, identity residual) -----
    B, in_planes, planes = 2, 128, 32
    assert in_planes == expansion * planes
    params = init_params(k1, in_planes, planes, expansion)
    x = jax.random.normal(k2, (B, in_planes, H, W), jnp.float32)

    out = jax.jit(lambda xx: bottleneck_forward(xx, params))(x)
    jax.block_until_ready(out)
    assert out.shape == (B, expansion * planes, H, W), out.shape
    assert out.dtype == jnp.float32
    ref = bottleneck_ref(x, params)
    err = float(jnp.max(jnp.abs(out - ref)))
    tol = 2e-2 + 1e-2 * float(jnp.max(jnp.abs(ref)))
    assert err <= tol, ("no-downsample", err, tol)

    # --- Config 2: downsample (1x1 conv + BN) fused into the same kernel ----
    B2, in2, planes2 = 2, 64, 32
    params2 = init_params(k3, in2, planes2, expansion)
    x2 = jax.random.normal(k4, (B2, in2, H, W), jnp.float32)

    out2 = jax.jit(lambda xx: bottleneck_forward(xx, params2))(x2)
    jax.block_until_ready(out2)
    assert out2.shape == (B2, expansion * planes2, H, W), out2.shape
    ref2 = bottleneck_ref(x2, params2)
    err2 = float(jnp.max(jnp.abs(out2 - ref2)))
    tol2 = 2e-2 + 1e-2 * float(jnp.max(jnp.abs(ref2)))
    assert err2 <= tol2, ("downsample", err2, tol2)

    print("KERNEL_OK")
</pallas_src>

<mosaic_0001>
module attributes {stable_mosaic.version = 11 : i64} {
  func.func @_bottleneck_kernel(%arg0: i32, %arg1: i32, %arg2: memref<1x8x16x128xf32, #tpu.memory_space<vmem>>, %arg3: memref<1x1x16x128xf32, #tpu.memory_space<vmem>>, %arg4: memref<1x1x16x128xf32, #tpu.memory_space<vmem>>, %arg5: memref<128x32xbf16, #tpu.memory_space<vmem>>, %arg6: memref<1x32xf32, #tpu.memory_space<vmem>>, %arg7: memref<1x32xf32, #tpu.memory_space<vmem>>, %arg8: memref<288x32xbf16, #tpu.memory_space<vmem>>, %arg9: memref<1x32xf32, #tpu.memory_space<vmem>>, %arg10: memref<1x32xf32, #tpu.memory_space<vmem>>, %arg11: memref<32x128xbf16, #tpu.memory_space<vmem>>, %arg12: memref<1x128xf32, #tpu.memory_space<vmem>>, %arg13: memref<1x128xf32, #tpu.memory_space<vmem>>, %arg14: memref<1x8x16x128xf32, #tpu.memory_space<vmem>>) attributes {dimension_semantics = [#tpu.dimension_semantics<parallel>, #tpu.dimension_semantics<parallel>], iteration_bounds = array<i64: 2, 2>, scalar_prefetch = 0 : i64, scratch_operands = 0 : i64, tpu.core_type = #tpu.core_type<tc>, window_params = [{transform_indices = @transform_0, window_bounds = array<i64: 1, 8, 16, 128>}, {transform_indices = @transform_1, window_bounds = array<i64: 1, 1, 16, 128>}, {transform_indices = @transform_2, window_bounds = array<i64: 1, 1, 16, 128>}, {pipeline_mode = #tpu.pipeline_mode<synchronous>, transform_indices = @transform_3, window_bounds = array<i64: 128, 32>}, {pipeline_mode = #tpu.pipeline_mode<synchronous>, transform_indices = @transform_4, window_bounds = array<i64: 1, 32>}, {pipeline_mode = #tpu.pipeline_mode<synchronous>, transform_indices = @transform_5, window_bounds = array<i64: 1, 32>}, {pipeline_mode = #tpu.pipeline_mode<synchronous>, transform_indices = @transform_6, window_bounds = array<i64: 288, 32>}, {pipeline_mode = #tpu.pipeline_mode<synchronous>, transform_indices = @transform_7, window_bounds = array<i64: 1, 32>}, {pipeline_mode = #tpu.pipeline_mode<synchronous>, transform_indices = @transform_8, window_bounds = array<i64: 1, 32>}, {pipeline_mode = #tpu.pipeline_mode<synchronous>, transform_indices = @transform_9, window_bounds = array<i64: 32, 128>}, {pipeline_mode = #tpu.pipeline_mode<synchronous>, transform_indices = @transform_10, window_bounds = array<i64: 1, 128>}, {pipeline_mode = #tpu.pipeline_mode<synchronous>, transform_indices = @transform_11, window_bounds = array<i64: 1, 128>}, {transform_indices = @transform_12, window_bounds = array<i64: 1, 8, 16, 128>}]} {
    %c0 = arith.constant 0 : index
    %c0_0 = arith.constant 0 : index
    %c0_1 = arith.constant 0 : index
    %c0_2 = arith.constant 0 : index
    %0 = vector.load %arg3[%c0, %c0_0, %c0_1, %c0_2] : memref<1x1x16x128xf32, #tpu.memory_space<vmem>>, vector<1x1x16x128xf32>
    %1 = vector.shape_cast %0 : vector<1x1x16x128xf32> to vector<1x16x128xf32>
    %c0_3 = arith.constant 0 : index
    %c0_4 = arith.constant 0 : index
    %c0_5 = arith.constant 0 : index
    %c0_6 = arith.constant 0 : index
    %2 = vector.load %arg2[%c0_3, %c0_4, %c0_5, %c0_6] : memref<1x8x16x128xf32, #tpu.memory_space<vmem>>, vector<1x8x16x128xf32>
    %3 = vector.shape_cast %2 : vector<1x8x16x128xf32> to vector<8x16x128xf32>
    %c0_7 = arith.constant 0 : index
    %c0_8 = arith.constant 0 : index
    %c0_9 = arith.constant 0 : index
    %c0_10 = arith.constant 0 : index
    %4 = vector.load %arg4[%c0_7, %c0_8, %c0_9, %c0_10] : memref<1x1x16x128xf32, #tpu.memory_space<vmem>>, vector<1x1x16x128xf32>
    %5 = vector.shape_cast %4 : vector<1x1x16x128xf32> to vector<1x16x128xf32>
    %6 = tpu.concatenate %1, %3, %5 in 0 : vector<1x16x128xf32>, vector<8x16x128xf32>, vector<1x16x128xf32> -> vector<10x16x128xf32>
    %7 = vector.shape_cast %6 : vector<10x16x128xf32> to vector<160x128xf32>
    %8 = arith.truncf %7 : vector<160x128xf32> to vector<160x128xbf16>
    %c0_11 = arith.constant 0 : index
    %c0_12 = arith.constant 0 : index
    %9 = vector.load %arg5[%c0_11, %c0_12] : memref<128x32xbf16, #tpu.memory_space<vmem>>, vector<128x32xbf16>
    %cst = arith.constant dense<0.000000e+00> : vector<160x32xf32>
    %10 = tpu.matmul %8, %9, %cst {dimension_numbers = #tpu.dot_dimension_numbers<[1], [0], [0], [1], [0, 0, 1, 1], [], []>} : vector<160x128xbf16>, vector<128x32xbf16>, vector<160x32xf32> -> vector<160x32xf32>
    %c0_13 = arith.constant 0 : index
    %c0_14 = arith.constant 0 : index
    %11 = vector.load %arg6[%c0_13, %c0_14] : memref<1x32xf32, #tpu.memory_space<vmem>>, vector<1x32xf32>
    %12 = vector.broadcast %11 : vector<1x32xf32> to vector<160x32xf32>
    %13 = arith.mulf %10, %12 : vector<160x32xf32>
    %c0_15 = arith.constant 0 : index
    %c0_16 = arith.constant 0 : index
    %14 = vector.load %arg7[%c0_15, %c0_16] : memref<1x32xf32, #tpu.memory_space<vmem>>, vector<1x32xf32>
    %15 = vector.broadcast %14 : vector<1x32xf32> to vector<160x32xf32>
    %16 = arith.addf %13, %15 : vector<160x32xf32>
    %cst_17 = arith.constant 0.000000e+00 : f32
    %17 = vector.broadcast %cst_17 : f32 to vector<160x32xf32>
    %18 = arith.maximumf %16, %17 : vector<160x32xf32>
    %19 = vector.shape_cast %18 : vector<160x32xf32> to vector<10x16x32xf32>
    %20 = tpu.iota {dimensions = array<i32: 0>} : vector<10x16x32xi32>
    %21 = tpu.iota {dimensions = array<i32: 1>} : vector<10x16x32xi32>
    %c8_i32 = arith.constant 8 : i32
    %22 = arith.muli %arg1, %c8_i32 : i32
    %23 = vector.broadcast %22 : i32 to vector<10x16x32xi32>
    %24 = arith.addi %23, %20 : vector<10x16x32xi32>
    %c1_i32 = arith.constant 1 : i32
    %25 = vector.broadcast %c1_i32 : i32 to vector<10x16x32xi32>
    %26 = arith.subi %24, %25 : vector<10x16x32xi32>
    %c0_i32 = arith.constant 0 : i32
    %27 = vector.broadcast %c0_i32 : i32 to vector<10x16x32xi32>
    %28 = arith.cmpi sge, %26, %27 : vector<10x16x32xi32>
    %c16_i32 = arith.constant 16 : i32
    %29 = vector.broadcast %c16_i32 : i32 to vector<10x16x32xi32>
    %30 = arith.cmpi slt, %26, %29 : vector<10x16x32xi32>
    %31 = arith.andi %28, %30 : vector<10x16x32xi1>
    %c14_i32 = arith.constant 14 : i32
    %32 = vector.broadcast %c14_i32 : i32 to vector<10x16x32xi32>
    %33 = arith.cmpi slt, %21, %32 : vector<10x16x32xi32>
    %34 = arith.andi %31, %33 : vector<10x16x32xi1>
    %cst_18 = arith.constant 0.000000e+00 : f32
    %35 = vector.broadcast %cst_18 : f32 to vector<10x16x32xf32>
    %36 = arith.select %34, %19, %35 : vector<10x16x32xi1>, vector<10x16x32xf32>
    %cst_19 = arith.constant 0.000000e+00 : f32
    %37 = vector.broadcast %cst_19 : f32 to vector<10x1x32xf32>
    %38 = vector.extract_strided_slice %36 {offsets = [0, 0, 0], sizes = [10, 15, 32], strides = [1, 1, 1]} : vector<10x16x32xf32> to vector<10x15x32xf32>
    %39 = tpu.concatenate %37, %38 in 1 : vector<10x1x32xf32>, vector<10x15x32xf32> -> vector<10x16x32xf32>
    %40 = vector.extract_strided_slice %36 {offsets = [0, 1, 0], sizes = [10, 15, 32], strides = [1, 1, 1]} : vector<10x16x32xf32> to vector<10x15x32xf32>
    %41 = tpu.concatenate %40, %37 in 1 : vector<10x15x32xf32>, vector<10x1x32xf32> -> vector<10x16x32xf32>
    %42 = vector.extract_strided_slice %39 {offsets = [0, 0, 0], sizes = [8, 16, 32], strides = [1, 1, 1]} : vector<10x16x32xf32> to vector<8x16x32xf32>
    %43 = vector.extract_strided_slice %36 {offsets = [0, 0, 0], sizes = [8, 16, 32], strides = [1, 1, 1]} : vector<10x16x32xf32> to vector<8x16x32xf32>
    %44 = vector.extract_strided_slice %41 {offsets = [0, 0, 0], sizes = [8, 16, 32], strides = [1, 1, 1]} : vector<10x16x32xf32> to vector<8x16x32xf32>
    %45 = vector.extract_strided_slice %39 {offsets = [1, 0, 0], sizes = [8, 16, 32], strides = [1, 1, 1]} : vector<10x16x32xf32> to vector<8x16x32xf32>
    %46 = vector.extract_strided_slice %36 {offsets = [1, 0, 0], sizes = [8, 16, 32], strides = [1, 1, 1]} : vector<10x16x32xf32> to vector<8x16x32xf32>
    %47 = vector.extract_strided_slice %41 {offsets = [1, 0, 0], sizes = [8, 16, 32], strides = [1, 1, 1]} : vector<10x16x32xf32> to vector<8x16x32xf32>
    %48 = vector.extract_strided_slice %39 {offsets = [2, 0, 0], sizes = [8, 16, 32], strides = [1, 1, 1]} : vector<10x16x32xf32> to vector<8x16x32xf32>
    %49 = vector.extract_strided_slice %36 {offsets = [2, 0, 0], sizes = [8, 16, 32], strides = [1, 1, 1]} : vector<10x16x32xf32> to vector<8x16x32xf32>
    %50 = vector.extract_strided_slice %41 {offsets = [2, 0, 0], sizes = [8, 16, 32], strides = [1, 1, 1]} : vector<10x16x32xf32> to vector<8x16x32xf32>
    %51 = tpu.concatenate %42, %43, %44, %45, %46, %47, %48, %49, %50 in 2 : vector<8x16x32xf32>, vector<8x16x32xf32>, vector<8x16x32xf32>, vector<8x16x32xf32>, vector<8x16x32xf32>, vector<8x16x32xf32>, vector<8x16x32xf32>, vector<8x16x32xf32>, vector<8x16x32xf32> -> vector<8x16x288xf32>
    %52 = arith.truncf %51 : vector<8x16x288xf32> to vector<8x16x288xbf16>
    %53 = vector.shape_cast %52 : vector<8x16x288xbf16> to vector<128x288xbf16>
    %c0_20 = arith.constant 0 : index
    %c0_21 = arith.constant 0 : index
    %54 = vector.load %arg8[%c0_20, %c0_21] : memref<288x32xbf16, #tpu.memory_space<vmem>>, vector<288x32xbf16>
    %cst_22 = arith.constant dense<0.000000e+00> : vector<128x32xf32>
    %55 = tpu.matmul %53, %54, %cst_22 {dimension_numbers = #tpu.dot_dimension_numbers<[1], [0], [0], [1], [0, 0, 1, 1], [], []>} : vector<128x288xbf16>, vector<288x32xbf16>, vector<128x32xf32> -> vector<128x32xf32>
    %c0_23 = arith.constant 0 : index
    %c0_24 = arith.constant 0 : index
    %56 = vector.load %arg9[%c0_23, %c0_24] : memref<1x32xf32, #tpu.memory_space<vmem>>, vector<1x32xf32>
    %57 = vector.broadcast %56 : vector<1x32xf32> to vector<128x32xf32>
    %58 = arith.mulf %55, %57 : vector<128x32xf32>
    %c0_25 = arith.constant 0 : index
    %c0_26 = arith.constant 0 : index
    %59 = vector.load %arg10[%c0_25, %c0_26] : memref<1x32xf32, #tpu.memory_space<vmem>>, vector<1x32xf32>
    %60 = vector.broadcast %59 : vector<1x32xf32> to vector<128x32xf32>
    %61 = arith.addf %58, %60 : vector<128x32xf32>
    %cst_27 = arith.constant 0.000000e+00 : f32
    %62 = vector.broadcast %cst_27 : f32 to vector<128x32xf32>
    %63 = arith.maximumf %61, %62 : vector<128x32xf32>
    %64 = arith.truncf %63 : vector<128x32xf32> to vector<128x32xbf16>
    %c0_28 = arith.constant 0 : index
    %c0_29 = arith.constant 0 : index
    %65 = vector.load %arg11[%c0_28, %c0_29] : memref<32x128xbf16, #tpu.memory_space<vmem>>, vector<32x128xbf16>
    %cst_30 = arith.constant dense<0.000000e+00> : vector<128x128xf32>
    %66 = tpu.matmul %64, %65, %cst_30 {dimension_numbers = #tpu.dot_dimension_numbers<[1], [0], [0], [1], [0, 0, 1, 1], [], []>} : vector<128x32xbf16>, vector<32x128xbf16>, vector<128x128xf32> -> vector<128x128xf32>
    %c0_31 = arith.constant 0 : index
    %c0_32 = arith.constant 0 : index
    %67 = vector.load %arg12[%c0_31, %c0_32] : memref<1x128xf32, #tpu.memory_space<vmem>>, vector<1x128xf32>
    %68 = vector.broadcast %67 : vector<1x128xf32> to vector<128x128xf32>
    %69 = arith.mulf %66, %68 : vector<128x128xf32>
    %c0_33 = arith.constant 0 : index
    %c0_34 = arith.constant 0 : index
    %70 = vector.load %arg13[%c0_33, %c0_34] : memref<1x128xf32, #tpu.memory_space<vmem>>, vector<1x128xf32>
    %71 = vector.broadcast %70 : vector<1x128xf32> to vector<128x128xf32>
    %72 = arith.addf %69, %71 : vector<128x128xf32>
    %c0_35 = arith.constant 0 : index
    %c0_36 = arith.constant 0 : index
    %c0_37 = arith.constant 0 : index
    %c0_38 = arith.constant 0 : index
    %73 = vector.load %arg2[%c0_35, %c0_36, %c0_37, %c0_38] : memref<1x8x16x128xf32, #tpu.memory_space<vmem>>, vector<1x8x16x128xf32>
    %74 = vector.shape_cast %73 : vector<1x8x16x128xf32> to vector<8x16x128xf32>
    %75 = vector.shape_cast %74 : vector<8x16x128xf32> to vector<128x128xf32>
    %76 = arith.addf %72, %75 : vector<128x128xf32>
    %cst_39 = arith.constant 0.000000e+00 : f32
    %77 = vector.broadcast %cst_39 : f32 to vector<128x128xf32>
    %78 = arith.maximumf %76, %77 : vector<128x128xf32>
    %79 = vector.shape_cast %78 : vector<128x128xf32> to vector<8x16x128xf32>
    %c0_40 = arith.constant 0 : index
    %c0_41 = arith.constant 0 : index
    %c0_42 = arith.constant 0 : index
    %c0_43 = arith.constant 0 : index
    %80 = vector.load %arg14[%c0_40, %c0_41, %c0_42, %c0_43] : memref<1x8x16x128xf32, #tpu.memory_space<vmem>>, vector<1x8x16x128xf32>
    %81 = vector.shape_cast %80 : vector<1x8x16x128xf32> to vector<8x16x128xf32>
    %82 = vector.shape_cast %79 : vector<8x16x128xf32> to vector<1x8x16x128xf32>
    tpu.vector_store %arg14[%c0_40, %c0_41, %c0_42, %c0_43], %82 {strides = array<i32>} : memref<1x8x16x128xf32, #tpu.memory_space<vmem>>, vector<1x8x16x128xf32>,
    return
  }
  func.func @transform_0(%arg0: i32, %arg1: i32) -> (i32, i32, i32, i32) {
    %c0_i32 = arith.constant 0 : i32
    %c0_i32_0 = arith.constant 0 : i32
    %c0_i32_1 = arith.constant 0 : i32
    return %arg0, %arg1, %c0_i32, %c0_i32_0 : i32, i32, i32, i32
  }
  func.func @transform_1(%arg0: i32, %arg1: i32) -> (i32, i32, i32, i32) {
    %c0_i32 = arith.constant 0 : i32
    %c0_i32_0 = arith.constant 0 : i32
    %c0_i32_1 = arith.constant 0 : i32
    return %arg0, %arg1, %c0_i32, %c0_i32_0 : i32, i32, i32, i32
  }
  func.func @transform_2(%arg0: i32, %arg1: i32) -> (i32, i32, i32, i32) {
    %c0_i32 = arith.constant 0 : i32
    %c0_i32_0 = arith.constant 0 : i32
    %c0_i32_1 = arith.constant 0 : i32
    return %arg0, %arg1, %c0_i32, %c0_i32_0 : i32, i32, i32, i32
  }
  func.func @transform_3(%arg0: i32, %arg1: i32) -> (i32, i32) {
    %c0_i32 = arith.constant 0 : i32
    %c0_i32_0 = arith.constant 0 : i32
    %c0_i32_1 = arith.constant 0 : i32
    return %c0_i32, %c0_i32_0 : i32, i32
  }
  func.func @transform_4(%arg0: i32, %arg1: i32) -> (i32, i32) {
    %c0_i32 = arith.constant 0 : i32
    %c0_i32_0 = arith.constant 0 : i32
    %c0_i32_1 = arith.constant 0 : i32
    return %c0_i32, %c0_i32_0 : i32, i32
  }
  func.func @transform_5(%arg0: i32, %arg1: i32) -> (i32, i32) {
    %c0_i32 = arith.constant 0 : i32
    %c0_i32_0 = arith.constant 0 : i32
    %c0_i32_1 = arith.constant 0 : i32
    return %c0_i32, %c0_i32_0 : i32, i32
  }
  func.func @transform_6(%arg0: i32, %arg1: i32) -> (i32, i32) {
    %c0_i32 = arith.constant 0 : i32
    %c0_i32_0 = arith.constant 0 : i32
    %c0_i32_1 = arith.constant 0 : i32
    return %c0_i32, %c0_i32_0 : i32, i32
  }
  func.func @transform_7(%arg0: i32, %arg1: i32) -> (i32, i32) {
    %c0_i32 = arith.constant 0 : i32
    %c0_i32_0 = arith.constant 0 : i32
    %c0_i32_1 = arith.constant 0 : i32
    return %c0_i32, %c0_i32_0 : i32, i32
  }
  func.func @transform_8(%arg0: i32, %arg1: i32) -> (i32, i32) {
    %c0_i32 = arith.constant 0 : i32
    %c0_i32_0 = arith.constant 0 : i32
    %c0_i32_1 = arith.constant 0 : i32
    return %c0_i32, %c0_i32_0 : i32, i32
  }
  func.func @transform_9(%arg0: i32, %arg1: i32) -> (i32, i32) {
    %c0_i32 = arith.constant 0 : i32
    %c0_i32_0 = arith.constant 0 : i32
    %c0_i32_1 = arith.constant 0 : i32
    return %c0_i32, %c0_i32_0 : i32, i32
  }
  func.func @transform_10(%arg0: i32, %arg1: i32) -> (i32, i32) {
    %c0_i32 = arith.constant 0 : i32
    %c0_i32_0 = arith.constant 0 : i32
    %c0_i32_1 = arith.constant 0 : i32
    return %c0_i32, %c0_i32_0 : i32, i32
  }
  func.func @transform_11(%arg0: i32, %arg1: i32) -> (i32, i32) {
    %c0_i32 = arith.constant 0 : i32
    %c0_i32_0 = arith.constant 0 : i32
    %c0_i32_1 = arith.constant 0 : i32
    return %c0_i32, %c0_i32_0 : i32, i32
  }
  func.func @transform_12(%arg0: i32, %arg1: i32) -> (i32, i32, i32, i32) {
    %c0_i32 = arith.constant 0 : i32
    %c0_i32_0 = arith.constant 0 : i32
    %c0_i32_1 = arith.constant 0 : i32
    return %arg0, %arg1, %c0_i32, %c0_i32_0 : i32, i32, i32, i32
  }
}

</mosaic_0001>

<bundles_post_ra>
// kernel: _lambda_.1
= control target key start
LH: loop header
LB: loop body
LE: loop exit
PB: predicated region body
PF: predicated region fallthrough
CT: control target
= control target key end

     0   :  { %s2838_s21 = smov 0   ;;  %s2840_s22 = smov 0   ;;  %s3736_s0 = inlined_call_operand.vmem [shape: f32[2,16,16,128], index: 0, kind: input, shape index: {}]   ;;  %s3737_s1 = inlined_call_operand.vmem [shape: f32[2,2,16,128], index: 1, kind: input, shape index: {}]   ;;  %s3738_s2 = inlined_call_operand.vmem [shape: f32[2,2,16,128], index: 2, kind: input, shape index: {}]   ;;  %s3739_s3 = inlined_call_operand.vmem [shape: bf16[128,32], index: 3, kind: input, shape index: {}]   ;;  %s3740_s4 = inlined_call_operand.vmem [shape: f32[1,32], index: 4, kind: input, shape index: {}]   ;;  %s3741_s5 = inlined_call_operand.vmem [shape: f32[1,32], index: 5, kind: input, shape index: {}]   ;;  %s3742_s6 = inlined_call_operand.vmem [shape: bf16[288,32], index: 6, kind: input, shape index: {}]   ;;  %s3743_s7 = inlined_call_operand.vmem [shape: f32[1,32], index: 7, kind: input, shape index: {}]   ;;  %s3744_s8 = inlined_call_operand.vmem [shape: f32[1,32], index: 8, kind: input, shape index: {}]   ;;  %s3745_s9 = inlined_call_operand.vmem [shape: bf16[32,128], index: 9, kind: input, shape index: {}]   ;;  %s3746_s10 = inlined_call_operand.vmem [shape: f32[1,128], index: 10, kind: input, shape index: {}]   ;;  %s3747_s11 = inlined_call_operand.vmem [shape: f32[1,128], index: 11, kind: input, shape index: {}]   ;;  %s3748_s12 = inlined_call_operand.vmem [shape: f32[2,16,16,128], index: 12, kind: output, shape index: {}]  }
   0x1   :  { %s2842_s23 = smov 0   ;;  %s2844_s24 = smov 0  }
   0x2   :  { %s2846_s25 = smov 0  }
   0x3 LB: > { %s31_s26 = sadd.s32 1, %s2760_s23  ;;  %s34_s27 = sadd.s32 1, %s2764_s24  ;;  %s2768_s25 = sphi %s2846_s25, %s22_s25   ;;  %s2764_s24 = sphi %s2844_s24, %s3780_s24   ;;  %s2760_s23 = sphi %s2842_s23, %s3779_s23   ;;  %s2756_s22 = sphi %s2840_s22, %s3778_s22   ;;  %s2752_s21 = sphi %s2838_s21, %s3777_s21  }
   0x4   : > { %p32_p0 = scmp.ge.s32.totalorder %s31_s26, 2  ;;  %p2238_p1 = scmp.ge.s32.totalorder %s2768_s25, 1 }
   0x5   : > { %p416_p2 = scmp.lt.s32.totalorder %s2768_s25, 5 }
   0x6   : > { %s3782_s26 = smov (%p32_p0, %s31_s26), 0  ;;  %s3784_s27 = smov (!%p32_p0, %s34_s27), %s2764_s24 }
   0x7   : > { %p417_p3 = pnand %p2238_p1, %p416_p2  ;;  %p36_p4 = scmp.ge.s32.totalorder %s3784_s27, 2 }
   0x9   : > { %s3786_s27 = smov (%p36_p4, %s3784_s27), 0  ;;  %420 = sbr.rel (%p417_p3) target bundleno = 882 (0x372), region = 68 }
   0xa   : > { %3757 = sst [smem:[#allocation2_spill]] %s3786_s27 }
   0xe   : > { %v2400_v0 = vld [vmem:[%s3739_s3 + $0x38] sm:$0xff]  ;;  %v2399_v1 = vld [vmem:[%s3739_s3 + $0x30] sm:$0xff]  ;;  %p487_p5 = scmp.lt.s32.totalorder %s2756_s22, 1  ;;  %v2398_v2 = vld [vmem:[%s3739_s3 + $0x28] sm:$0xff]  ;;  %p499_p6 = scmp.lt.s32.totalorder %s2752_s21, 1  ;;  %v748_v35 = vlaneseq  ;;  %vm921_vm5 = vcmask 1046528  }
   0xf   : > { %621 = vmatpush.bf16.msra.mxu0 %v2400_v0  ;;  %v2397_v3 = vld [vmem:[%s3739_s3 + $0x20] sm:$0xff]  ;;  %v2396_v4 = vld [vmem:[%s3739_s3 + $0x18] sm:$0xff]  ;;  %v2395_v5 = vld [vmem:[%s3739_s3 + $0x10] sm:$0xff]  ;;  %s2893_s15 = sshll.u32 %s2752_s21, 3  ;;  %vm862_vm6 = vcmask 1040384   ;;  %s2772_s20 = smov 96  }
  0x10   : > { %s3788_s22 = smov (!%p487_p5, %s2756_s22), 1  ;;  %v2394_v6 = vld [vmem:[%s3739_s3 + $0x8] sm:$0xff]  ;;  %p489_p7 = scmp.lt.s32.totalorder %s2893_s15, 15  ;;  %v2393_v7 = vld [vmem:[%s3739_s3] sm:$0xff]  ;;  %v2941_v36 = vstv %s2893_s15  ;;  %v749_v41 = vshrl.u32 %v748_v35, 7 }
  0x11   : > { %s500_s18 = scalar_select %p499_p6, %s2752_s21, 1  ;;  %v2938_v34 = vld [vmem:[%s3740_s4] ss:$0 sm:$0xff]  ;;  %v2286_v42 = vadd.s32 4294967295, %v2941_v36  ;;  %vm771_vm7 = vcmp.ge.s32.totalorder %v2941_v36, 0  ;;  %vm781_vm8 = vcmp.lt.s32.totalorder %v2941_v36, 16 }
  0x12   : > { %s2244_s29 = sshll.u32 %s3788_s22, 2  ;;  %s2241_s27 = sshll.u32 %s3788_s22, 5  ;;  %v2946_v39 = vld [vmem:[%s3741_s5] ss:$0 sm:$0xff]  ;;  %v2951_v44 = vadd.s32 8, %v749_v41  ;;  %vm791_vm9 = vmand %vm771_vm7, %vm781_vm8 }
  0x13   : > { %622 = vmatpush.bf16.msra.mxu0 %v2399_v1  ;;  %s2243_s28 = sshll.u32 %s500_s18, 1  ;;  %vm770_vm0 = vcmp.ge.s32.totalorder %v2286_v42, 0  ;;  %vm780_vm1 = vcmp.lt.s32.totalorder %v2286_v42, 16  ;;  %s2771_s18 = smov 64  }
  0x14   : > { %s2887_s30 = sadd.s32 %s2244_s29, %s2243_s28  ;;  %vm790_vm2 = vmand %vm770_vm0, %vm780_vm1  ;;  %vm801_vm3 = vcmp.lt.s32.totalorder %v2951_v44, 14 }
  0x15   : > { %s3749_s16 = sshll.u32 %s2887_s30, 3  ;;  %vm803_vm4 = vmand %vm790_vm2, %vm801_vm3 }
  0x16   : > { %s505_s28 = scalar_lea.vmem %s3737_s1, %s3749_s16  ;;  %vm805_vm10 = vmand %vm791_vm9, %vm801_vm3 }
  0x17   : > { %623 = vmatpush.bf16.msra.mxu0 %v2398_v2  ;;  %s490_s21 = scalar_select %p489_p7, %s2893_s15, 15  ;;  %v527_v8 = vld [vmem:[%s505_s28] sm:$0xff]  ;;  %v528_v9 = vld [vmem:[%s505_s28 + $0x8] sm:$0xff] }
  0x18   : > { %v547_v10 = vpack.c.bf16 %v528_v9, %v527_v8  ;;  %s3758_s15 = sshll.u32 %s2887_s30, 3  ;;  %s2770_s30 = smov 32   ;;  %v753_v9 = vadd.s32 2, %v2941_v36 }
  0x19   : > { %s2240_s14 = sshll.u32 %s490_s21, 1 }
  0x1a   : > { %s2909_s17 = sadd.s32 %s2241_s27, %s2240_s14  ;;  %s514_s14 = scalar_lea.vmem %s3738_s2, %s3758_s15 }
  0x1b   : > { %624 = vmatpush.bf16.msra.mxu0 %v2397_v3  ;;  %s2242_s19 = sshll.u32 %s2909_s17, 3  ;;  %v545_v50 = vld [vmem:[%s514_s14] sm:$0xff]  ;;  %v546_v51 = vld [vmem:[%s514_s14 + $0x8] sm:$0xff] }
  0x1c   : > { %s2917_s16 = scalar_lea.vmem %s3736_s0, %s2242_s19  ;;  %v556_v55 = vpack.c.bf16 %v546_v51, %v545_v50  ;;  %s3658_s15 = scalar_lea.vmem %s3748_s12, %s2242_s19 }
  0x1d   : > { %v529_v11 = vld [vmem:[%s2917_s16] sm:$0xff]  ;;  %v530_v12 = vld [vmem:[%s2917_s16 + $0x8] sm:$0xff]  ;;  %v531_v14 = vld [vmem:[%s2917_s16 + $0x10] sm:$0xff] }
  0x1e   : > { %v548_v13 = vpack.c.bf16 %v530_v12, %v529_v11  ;;  %v532_v15 = vld [vmem:[%s2917_s16 + $0x18] sm:$0xff]  ;;  %v533_v17 = vld [vmem:[%s2917_s16 + $0x20] sm:$0xff]  ;;  %v534_v18 = vld [vmem:[%s2917_s16 + $0x28] sm:$0xff] }
  0x1f   : > { %625 = vmatpush.bf16.msra.mxu0 %v2396_v4  ;;  %v549_v16 = vpack.c.bf16 %v532_v15, %v531_v14  ;;  %v550_v19 = vpack.c.bf16 %v534_v18, %v533_v17  ;;  %v535_v20 = vld [vmem:[%s2917_s16 + $0x30] sm:$0xff]  ;;  %v536_v21 = vld [vmem:[%s2917_s16 + $0x38] sm:$0xff]  ;;  %v537_v23 = vld [vmem:[%s2917_s16 + $0x40] sm:$0xff]  ;;  %v2287_v17 = vadd.s32 4294967295, %v753_v9 }
  0x20   : > { %v551_v22 = vpack.c.bf16 %v536_v21, %v535_v20  ;;  %v538_v24 = vld [vmem:[%s2917_s16 + $0x48] sm:$0xff]  ;;  %v539_v26 = vld [vmem:[%s2917_s16 + $0x50] sm:$0xff]  ;;  %v540_v27 = vld [vmem:[%s2917_s16 + $0x58] sm:$0xff] }
  0x21   : > { %v552_v25 = vpack.c.bf16 %v538_v24, %v537_v23  ;;  %v553_v28 = vpack.c.bf16 %v540_v27, %v539_v26  ;;  %v541_v29 = vld [vmem:[%s2917_s16 + $0x60] sm:$0xff]  ;;  %v542_v30 = vld [vmem:[%s2917_s16 + $0x68] sm:$0xff]  ;;  %v543_v32 = vld [vmem:[%s2917_s16 + $0x70] sm:$0xff]  ;;  %vm772_vm11 = vcmp.ge.s32.totalorder %v2287_v17, 0  ;;  %vm782_vm12 = vcmp.lt.s32.totalorder %v2287_v17, 16 }
  0x22   : > { %v554_v31 = vpack.c.bf16 %v542_v30, %v541_v29  ;;  %v544_v33 = vld [vmem:[%s2917_s16 + $0x78] sm:$0xff]  ;;  %vm792_vm13 = vmand %vm772_vm11, %vm782_vm12 }
  0x23   : > { %626 = vmatpush.bf16.msra.mxu0 %v2395_v5  ;;  %v555_v37 = vpack.c.bf16 %v544_v33, %v543_v32  ;;  %vm807_vm14 = vmand %vm792_vm13, %vm801_vm3  ;;  %v754_v32 = vadd.s32 3, %v2941_v36 }
  0x27   : > { %627 = vmatpush.bf16.msra.mxu0 %v2394_v6 }
  0x2b   : > { %628 = vmatpush.bf16.msra.mxu0 %v2393_v7 }
  0x2e   : > { %629 = vmatmul.bf16.vlgmr.msra.gmra.mxu0 %v547_v10 }
  0x3e   : > { %634 = vmatmul.bf16.gmra.mxu0 %v548_v13 }
  0x4e   : > { %639 = vmatmul.bf16.gmra.mxu0 %v549_v16 }
  0x5e   : > { %644 = vmatmul.bf16.gmra.mxu0 %v550_v19 }
  0x6e   : > { %649 = vmatmul.bf16.gmra.mxu0 %v551_v22 }
  0x7e   : > { %654 = vmatmul.bf16.gmra.mxu0 %v552_v25 }
  0x8e   : > { %659 = vmatmul.bf16.gmra.mxu0 %v553_v28 }
  0x9e   : > { %664 = vmatmul.bf16.gmra.mxu0 %v554_v31 }
  0xab   : > { %v630_v38 = vpop.f32.mrf.mxu0 }
  0xac   : > { %v684_v40 = vmul.f32 %v2938_v34, %v630_v38 }
  0xae   : > { %669 = vmatmul.bf16.gmra.mxu0 %v555_v37  ;;  %v708_v43 = vadd.f32 %v2946_v39, %v684_v40 }
  0xb0   : > { %v728_v45 = vmax.f32 %v708_v43, 0.0 }
  0xb2   : > { %v2963_v49 = vsel %vm790_vm2, %v728_v45, 0.0  ;;  %v2288_v45 = vadd.s32 4294967295, %v754_v32 }
  0xb3   : > { %v632_v46 = vpop.f32.mrf.mxu0  ;;  %v3750_v54 = vrot.slane %v2963_v49, 7  ;;  %v922_v57 = vrot.slane %v2963_v49, 1 }
  0xb4   : > { %v685_v47 = vmul.f32 %v2938_v34, %v632_v46  ;;  %vm773_vm15 = vcmp.ge.s32.totalorder %v2288_v45, 0  ;;  %vm783_vm0 = vcmp.lt.s32.totalorder %v2288_v45, 16 }
  0xb5   : > { %vm793_vm1 = vmand %vm773_vm15, %vm783_vm0 }
  0xb6   : > { %v709_v48 = vadd.f32 %v2946_v39, %v685_v47  ;;  %vm809_vm2 = vmand %vm793_vm1, %vm801_vm3 }
  0xb8   : > { %v729_v52 = vmax.f32 %v709_v48, 0.0 }
  0xba   : > { %v823_v53 = vsel %vm803_vm4, %v729_v52, 0.0 }
  0xbb   : > { %v635_v56 = vpop.f32.mrf.mxu0  ;;  %v2468_v58 = vpack.i.bf16 %v823_v53, %v2963_v49  ;;  %v864_v59 = vrot.slane %v823_v53, 7  ;;  %v923_v60 = vrot.slane %v823_v53, 1 }
  0xbc   : > { %v686_v61 = vmul.f32 %v2938_v34, %v635_v56 }
  0xbd   : > { %2469 = vrot.lane.b32.xlu0 %v2468_v58, %s2770_s30  ;;  %v924_v62 = vsel %vm921_vm5, %v922_v57, %v923_v60  ;;  %v970_v63 = vsel %vm921_vm5, %v923_v60, 0.0  ;;  %v2975_v0 = vsel %vm862_vm6, %v3750_v54, %v864_v59  ;;  %v2411_v60 = vld [vmem:[%s3742_s6 + $0x50] sm:$0xff] }
  0xbe   : > { %v710_v1 = vadd.f32 %v2946_v39, %v686_v61  ;;  %674 = vmatmul.bf16.gmra.mxu0 %v556_v55  ;;  %v2478_v2 = vpack.i.bf16 %v970_v63, %v924_v62 }
  0xc0   : > { %2479 = vrot.lane.b32.xlu1 %v2478_v2, %s2771_s18  ;;  %v730_v3 = vmax.f32 %v710_v1, 0.0 }
  0xc2   : > { %v2982_v6 = vsel %vm791_vm9, %v730_v3, 0.0  ;;  %v755_v3 = vadd.s32 4, %v2941_v36 }
  0xc3   : > { %v637_v4 = vpop.f32.mrf.mxu0  ;;  %v866_v10 = vrot.slane %v2982_v6, 7  ;;  %v925_v12 = vrot.slane %v2982_v6, 1 }
  0xc4   : > { %v687_v5 = vmul.f32 %v2938_v34, %v637_v4 }
  0xc5   : > { %v3001_v21 = vsel %vm862_vm6, 0.0, %v866_v10 }
  0xc6   : > { %v711_v7 = vadd.f32 %v2946_v39, %v687_v5 }
  0xc8   : > { %v731_v8 = vmax.f32 %v711_v7, 0.0 }
  0xca   : > { %v2989_v11 = vsel %vm805_vm10, %v731_v8, 0.0 }
  0xcb   : > { %v640_v13 = vpop.f32.mrf.mxu0  ;;  %v926_v14 = vrot.slane %v2989_v11, 1  ;;  %v867_v15 = vrot.slane %v2989_v11, 7  ;;  %v2498_v30 = vpack.i.bf16 %v2989_v11, %v2982_v6 }
  0xcc   : > { %v688_v16 = vmul.f32 %v2938_v34, %v640_v13 }
  0xcd   : > { %v927_v18 = vsel %vm921_vm5, %v925_v12, %v926_v14  ;;  %v971_v19 = vsel %vm921_vm5, %v926_v14, 0.0  ;;  %v2998_v20 = vsel %vm862_vm6, %v866_v10, %v867_v15  ;;  %v2289_v14 = vadd.s32 4294967295, %v755_v3 }
  0xce   : > { %v712_v22 = vadd.f32 %v2946_v39, %v688_v16  ;;  %v2473_v23 = vpack.i.bf16 %v971_v19, %v927_v18  ;;  %v2488_v24 = vpack.i.bf16 %v2998_v20, %v3001_v21 }
  0xcf   : > { %vm774_vm4 = vcmp.ge.s32.totalorder %v2289_v14, 0  ;;  %vm784_vm7 = vcmp.lt.s32.totalorder %v2289_v14, 16 }
  0xd0   : > { %2474 = vrot.lane.b32.xlu0 %v2473_v23, %s2770_s30  ;;  %2489 = vrot.lane.b32.xlu2 %v2488_v24, %s2772_s20  ;;  %v732_v25 = vmax.f32 %v712_v22, 0.0  ;;  %vm794_vm8 = vmand %vm774_vm4, %vm784_vm7  ;;  %vm1286_vm7 = vcmask 261120  }
  0xd1   : > { %vm811_vm9 = vmand %vm794_vm8, %vm801_vm3 }
  0xd2   : > { %v3009_v28 = vsel %vm792_vm13, %v732_v25, 0.0 }
  0xd3   : > { %v642_v26 = vpop.f32.mrf.mxu0  ;;  %v869_v33 = vrot.slane %v3009_v28, 7  ;;  %v928_v41 = vrot.slane %v3009_v28, 1 }
  0xd4   : > { %v689_v27 = vmul.f32 %v2938_v34, %v642_v26 }
  0xd5   : > { %v3035_v47 = vsel %vm862_vm6, 0.0, %v869_v33 }
  0xd6   : > { %v713_v29 = vadd.f32 %v2946_v39, %v689_v27 }
  0xd8   : > { %v733_v31 = vmax.f32 %v713_v29, 0.0  ;;  %2499 = vrot.lane.b32.xlu0 %v2498_v30, %s2770_s30  ;;  %v2403_v30 = vld [vmem:[%s3742_s6 + $0x10] sm:$0xff] }
  0xda   : > { %v3019_v35 = vsel %vm807_vm14, %v733_v31, 0.0 }
  0xdb   : > { %v645_v37 = vpop.f32.mrf.mxu0  ;;  %v3023_v38 = vpack.i.bf16 %v3019_v35, %v3009_v28  ;;  %v870_v40 = vrot.slane %v3019_v35, 7  ;;  %v929_v42 = vrot.slane %v3019_v35, 1 }
  0xdc   : > { %v690_v43 = vmul.f32 %v2938_v34, %v645_v37 }
  0xdd   : > { %2494 = vrot.lane.b32.xlu2 %v3023_v38, %s2772_s20  ;;  %v3032_v46 = vsel %vm862_vm6, %v869_v33, %v870_v40  ;;  %v930_v48 = vsel %vm921_vm5, %v928_v41, %v929_v42  ;;  %v972_v50 = vsel %vm921_vm5, %v929_v42, 0.0  ;;  %v756_v41 = vadd.s32 5, %v2941_v36 }
  0xde   : > { %v714_v51 = vadd.f32 %v2946_v39, %v690_v43  ;;  %v2483_v52 = vpack.i.bf16 %v3032_v46, %v3035_v47  ;;  %v1388_v53 = vpack.c.bf16 %v972_v50, %v972_v50  ;;  %v1386_v55 = vpack.c.bf16 %v930_v48, %v930_v48 }
  0xdf   : > { %v2508_v1 = vpack.i.bf16 %v972_v50, %v930_v48 }
  0xe0   : > { %2484 = vrot.lane.b32.xlu1 %v2483_v52, %s2771_s18  ;;  %v3043_v56 = vunpack.c.l.b16 %v1388_v53  ;;  %v3045_v57 = vunpack.c.l.b16 %v1386_v55  ;;  %v734_v58 = vmax.f32 %v714_v51, 0.0  ;;  %v3115_v55 = vld [vmem:[%s3742_s6 + $0x88] sm:$0xff] }
  0xe1   : > { %2422 = vmatpush.bf16.msra.mxu3 %v3115_v55 }
  0xe2   : > { %v3051_v62 = vsel %vm793_vm1, %v734_v58, 0.0 }
  0xe3   : > { %v647_v59 = vpop.f32.mrf.mxu0  ;;  %v872_v4 = vrot.slane %v3051_v62, 7  ;;  %v931_v10 = vrot.slane %v3051_v62, 1 }
  0xe4   : > { %v691_v61 = vmul.f32 %v2938_v34, %v647_v59 }
  0xe5   : > { %2504 = vrot.lane.b32.xlu2 %v2473_v23, %s2771_s18  ;;  %v3075_v16 = vsel %vm862_vm6, 0.0, %v872_v4 }
  0xe6   : > { %v715_v63 = vadd.f32 %v2946_v39, %v691_v61 }
  0xe8   : > { %v735_v2 = vmax.f32 %v715_v63, 0.0  ;;  %2509 = vrot.lane.b32.xlu1 %v2508_v1, %s2770_s30 }
  0xea   : > { %v3059_v5 = vsel %vm809_vm2, %v735_v2, 0.0 }
  0xeb   : > { %v650_v7 = vpop.f32.mrf.mxu0  ;;  %v3063_v8 = vpack.i.bf16 %v3059_v5, %v3051_v62  ;;  %v873_v9 = vrot.slane %v3059_v5, 7  ;;  %v932_v12 = vrot.slane %v3059_v5, 1 }
  0xec   : > { %v692_v13 = vmul.f32 %v2938_v34, %v650_v7  ;;  %v3136_v7 = vld [vmem:[%s3742_s6 + $0x80] sm:$0xff] }
  0xed   : > { %2519 = vrot.lane.b32.xlu2 %v3063_v8, %s2772_s20  ;;  %v3072_v15 = vsel %vm862_vm6, %v872_v4, %v873_v9  ;;  %v933_v17 = vsel %vm921_vm5, %v931_v10, %v932_v12  ;;  %v973_v18 = vsel %vm921_vm5, %v932_v12, 0.0  ;;  %2424 = vmatpush.bf16.msra.mxu3 %v3136_v7 }
  0xee   : > { %v716_v19 = vadd.f32 %v2946_v39, %v692_v13  ;;  %v2523_v22 = vpack.i.bf16 %v3072_v15, %v3075_v16  ;;  %v1392_v23 = vpack.c.bf16 %v973_v18, %v973_v18  ;;  %v1390_v24 = vpack.c.bf16 %v933_v17, %v933_v17 }
  0xef   : > { %v2538_v37 = vpack.i.bf16 %v973_v18, %v933_v17 }
  0xf0   : > { %2514 = vrot.lane.b32.xlu1 %v2483_v52, %s2772_s20  ;;  %2524 = vrot.lane.b32.xlu0 %v2523_v22, %s2771_s18  ;;  %v3084_v25 = vunpack.c.l.b16 %v1392_v23  ;;  %v3086_v26 = vunpack.c.l.b16 %v1390_v24  ;;  %v736_v27 = vmax.f32 %v716_v19, 0.0  ;;  %v757_v24 = vadd.s32 6, %v2941_v36 }
  0xf2   : > { %3759 = vst [vmem:[#allocation3_spill] sm:$0xff] %v3084_v25  ;;  %v3092_v32 = vsel %vm794_vm8, %v736_v27, 0.0 }
  0xf3   : > { %3760 = vst [vmem:[#allocation4_spill] sm:$0xff] %v3086_v26  ;;  %v652_v29 = vpop.f32.mrf.mxu0  ;;  %v875_v42 = vrot.slane %v3092_v32, 7  ;;  %v934_v51 = vrot.slane %v3092_v32, 1 }
  0xf4   : > { %v693_v31 = vmul.f32 %v2938_v34, %v652_v29 }
  0xf5   : > { %2534 = vrot.lane.b32.xlu2 %v2508_v1, %s2771_s18  ;;  %v3123_v59 = vsel %vm862_vm6, 0.0, %v875_v42 }
  0xf6   : > { %v717_v33 = vadd.f32 %v2946_v39, %v693_v31 }
  0xf8   : > { %v737_v40 = vmax.f32 %v717_v33, 0.0  ;;  %2539 = vrot.lane.b32.xlu1 %v2538_v37, %s2770_s30  ;;  %2529 = vrot.lane.b32.xlu0 %v3023_v38, %s2770_s30  ;;  %v2290_v38 = vadd.s32 4294967295, %v756_v41 }
  0xfa   : > { %v3102_v43 = vsel %vm811_vm9, %v737_v40, 0.0  ;;  %vm775_vm10 = vcmp.ge.s32.totalorder %v2290_v38, 0  ;;  %vm785_vm11 = vcmp.lt.s32.totalorder %v2290_v38, 16 }
  0xfb   : > { %v655_v45 = vpop.f32.mrf.mxu0  ;;  %v3106_v48 = vpack.i.bf16 %v3102_v43, %v3092_v32  ;;  %v876_v50 = vrot.slane %v3102_v43, 7  ;;  %v935_v52 = vrot.slane %v3102_v43, 1  ;;  %vm795_vm12 = vmand %vm775_vm10, %vm785_vm11 }
  0xfc   : > { %v694_v53 = vmul.f32 %v2938_v34, %v655_v45  ;;  %vm813_vm13 = vmand %vm795_vm12, %vm801_vm3 }
  0xfd   : > { %2549 = vrot.lane.b32.xlu2 %v3106_v48, %s2772_s20  ;;  %v3120_v58 = vsel %vm862_vm6, %v875_v42, %v876_v50  ;;  %v936_v61 = vsel %vm921_vm5, %v934_v51, %v935_v52  ;;  %v974_v63 = vsel %vm921_vm5, %v935_v52, 0.0 }
  0xfe   : > { %v718_v1 = vadd.f32 %v2946_v39, %v694_v53  ;;  %v2553_v2 = vpack.i.bf16 %v3120_v58, %v3123_v59  ;;  %v1394_v3 = vpack.c.bf16 %v936_v61, %v936_v61  ;;  %v1396_v4 = vpack.c.bf16 %v974_v63, %v974_v63 }
 0x100   : > { %2544 = vrot.lane.b32.xlu1 %v2523_v22, %s2772_s20  ;;  %2554 = vrot.lane.b32.xlu0 %v2553_v2, %s2771_s18  ;;  %v3138_v9 = vunpack.c.l.b16 %v1394_v3  ;;  %v3140_v10 = vunpack.c.l.b16 %v1396_v4  ;;  %v738_v12 = vmax.f32 %v718_v1, 0.0  ;;  %v2568_v22 = vpack.i.bf16 %v974_v63, %v936_v61 }
 0x102   : > { %3761 = vst [vmem:[#allocation5_spill] sm:$0xff] %v3138_v9  ;;  %v3147_v18 = vsel %vm795_vm12, %v738_v12, 0.0 }
 0x103   : > { %3762 = vst [vmem:[#allocation6_spill] sm:$0xff] %v3140_v10  ;;  %v657_v13 = vpop.f32.mrf.mxu0  ;;  %v878_v27 = vrot.slane %v3147_v18, 7  ;;  %v937_v40 = vrot.slane %v3147_v18, 1 }
 0x104   : > { %v695_v17 = vmul.f32 %v2938_v34, %v657_v13 }
 0x105   : > { %2564 = vrot.lane.b32.xlu2 %v2538_v37, %s2771_s18  ;;  %v3173_v50 = vsel %vm862_vm6, 0.0, %v878_v27 }
 0x106   : > { %v719_v19 = vadd.f32 %v2946_v39, %v695_v17 }
 0x108   : > { %v739_v23 = vmax.f32 %v719_v19, 0.0  ;;  %2569 = vrot.lane.b32.xlu1 %v2568_v22, %s2770_s30  ;;  %2559 = vrot.lane.b32.xlu0 %v3063_v8, %s2770_s30  ;;  %v2291_v8 = vadd.s32 4294967295, %v757_v24 }
 0x10a   : > { %v3157_v29 = vsel %vm813_vm13, %v739_v23, 0.0  ;;  %vm776_vm14 = vcmp.ge.s32.totalorder %v2291_v8, 0  ;;  %vm786_vm15 = vcmp.lt.s32.totalorder %v2291_v8, 16 }
 0x10b   : > { %v660_v31 = vpop.f32.mrf.mxu0  ;;  %v3161_v33 = vpack.i.bf16 %v3157_v29, %v3147_v18  ;;  %v879_v37 = vrot.slane %v3157_v29, 7  ;;  %v938_v41 = vrot.slane %v3157_v29, 1  ;;  %vm796_vm0 = vmand %vm776_vm14, %vm786_vm15 }
 0x10c   : > { %v696_v42 = vmul.f32 %v2938_v34, %v660_v31  ;;  %vm815_vm1 = vmand %vm796_vm0, %vm801_vm3 }
 0x10d   : > { %2579 = vrot.lane.b32.xlu2 %v3161_v33, %s2772_s20  ;;  %v3170_v45 = vsel %vm862_vm6, %v878_v27, %v879_v37  ;;  %v939_v51 = vsel %vm921_vm5, %v937_v40, %v938_v41  ;;  %v975_v52 = vsel %vm921_vm5, %v938_v41, 0.0  ;;  %v758_v27 = vadd.s32 7, %v2941_v36 }
 0x10e   : > { %v720_v53 = vadd.f32 %v2946_v39, %v696_v42  ;;  %v2583_v38 = vpack.i.bf16 %v3170_v45, %v3173_v50  ;;  %v1398_v61 = vpack.c.bf16 %v939_v51, %v939_v51  ;;  %v1400_v63 = vpack.c.bf16 %v975_v52, %v975_v52 }
 0x10f   : > { %v2598_v23 = vpack.i.bf16 %v975_v52, %v939_v51 }
 0x110   : > { %2574 = vrot.lane.b32.xlu1 %v2553_v2, %s2772_s20  ;;  %2584 = vrot.lane.b32.xlu0 %v2583_v38, %s2771_s18  ;;  %v3182_v1 = vunpack.c.l.b16 %v1398_v61  ;;  %v3184_v3 = vunpack.c.l.b16 %v1400_v63  ;;  %v740_v4 = vmax.f32 %v720_v53, 0.0 }
 0x112   : > { %3763 = vst [vmem:[#allocation7_spill] sm:$0xff] %v3182_v1  ;;  %v3190_v19 = vsel %vm796_vm0, %v740_v4, 0.0  ;;  %v2408_v4 = vld [vmem:[%s3742_s6 + $0x38] sm:$0xff] }
 0x113   : > { %3764 = vst [vmem:[#allocation8_spill] sm:$0xff] %v3184_v3  ;;  %v662_v12 = vpop.f32.mrf.mxu0  ;;  %v881_v31 = vrot.slane %v3190_v19, 7  ;;  %1705 = vmatpush.bf16.msra.mxu1 %v2408_v4 }
 0x114   : > { %v697_v17 = vmul.f32 %v2938_v34, %v662_v12  ;;  %v2416_v12 = vld [vmem:[%s3742_s6 + $0x78] sm:$0xff] }
 0x115   : > { %2594 = vrot.lane.b32.xlu2 %v2568_v22, %s2771_s18  ;;  %v940_v22 = vrot.slane %v3190_v19, 1  ;;  %v3216_v53 = vsel %vm862_vm6, 0.0, %v881_v31  ;;  %1754 = vmatpush.bf16.msra.mxu2 %v2416_v12 }
 0x116   : > { %v721_v2 = vadd.f32 %v2946_v39, %v697_v17 }
 0x118   : > { %v741_v24 = vmax.f32 %v721_v2, 0.0  ;;  %2599 = vrot.lane.b32.xlu1 %v2598_v23, %s2770_s30  ;;  %2589 = vrot.lane.b32.xlu0 %v3106_v48, %s2770_s30  ;;  %v2292_v48 = vadd.s32 4294967295, %v758_v27 }
 0x11a   : > { %v3200_v37 = vsel %vm815_vm1, %v741_v24, 0.0  ;;  %vm777_vm2 = vcmp.ge.s32.totalorder %v2292_v48, 0  ;;  %vm787_vm4 = vcmp.lt.s32.totalorder %v2292_v48, 16 }
 0x11b   : > { %v665_v40 = vpop.f32.mrf.mxu0  ;;  %v3205_v41 = vpack.i.bf16 %v3200_v37, %v3190_v19  ;;  %v882_v42 = vrot.slane %v3200_v37, 7  ;;  %v941_v8 = vrot.slane %v3200_v37, 1  ;;  %vm797_vm8 = vmand %vm777_vm2, %vm787_vm4 }
 0x11c   : > { %v698_v51 = vmul.f32 %v2938_v34, %v665_v40  ;;  %v2407_v40 = vld [vmem:[%s3742_s6 + $0x30] sm:$0xff]  ;;  %vm817_vm9 = vmand %vm797_vm8, %vm801_vm3 }
 0x11d   : > { %2609 = vrot.lane.b32.xlu2 %v3205_v41, %s2772_s20  ;;  %v3213_v52 = vsel %vm862_vm6, %v881_v31, %v882_v42  ;;  %v942_v61 = vsel %vm921_vm5, %v940_v22, %v941_v8  ;;  %v976_v63 = vsel %vm921_vm5, %v941_v8, 0.0  ;;  %v2415_v42 = vld [vmem:[%s3742_s6 + $0x70] sm:$0xff]  ;;  %1706 = vmatpush.bf16.msra.mxu1 %v2407_v40  ;;  %v2413_v40 = vld [vmem:[%s3742_s6 + $0x60] sm:$0xff] }
 0x11e   : > { %v722_v17 = vadd.f32 %v2946_v39, %v698_v51  ;;  %v2613_v2 = vpack.i.bf16 %v3213_v52, %v3216_v53  ;;  %v1402_v24 = vpack.c.bf16 %v942_v61, %v942_v61  ;;  %v1404_v27 = vpack.c.bf16 %v976_v63, %v976_v63  ;;  %1755 = vmatpush.bf16.msra.mxu2 %v2415_v42 }
 0x120   : > { %2604 = vrot.lane.b32.xlu1 %v2583_v38, %s2772_s20  ;;  %2614 = vrot.lane.b32.xlu0 %v2613_v2, %s2771_s18  ;;  %v1511_v31 = vunpack.c.l.b16 %v1402_v24  ;;  %v1514_v22 = vunpack.c.l.b16 %v1404_v27  ;;  %v742_v8 = vmax.f32 %v722_v17, 0.0  ;;  %v2628_v24 = vpack.i.bf16 %v976_v63, %v942_v61  ;;  %v2406_v17 = vld [vmem:[%s3742_s6 + $0x28] sm:$0xff] }
 0x121   : > { %v2414_v27 = vld [vmem:[%s3742_s6 + $0x68] sm:$0xff]  ;;  %1707 = vmatpush.bf16.msra.mxu1 %v2406_v17 }
 0x122   : > { %v1547_v51 = vpack.c.b16 %v1514_v22, %v1511_v31  ;;  %v3240_v48 = vsel %vm797_vm8, %v742_v8, 0.0  ;;  %1756 = vmatpush.bf16.msra.mxu2 %v2414_v27  ;;  %v2405_v22 = vld [vmem:[%s3742_s6 + $0x20] sm:$0xff] }
 0x123   : > { %v667_v4 = vpop.f32.mrf.mxu0  ;;  %v884_v61 = vrot.slane %v3240_v48, 7 }
 0x124   : > { %v699_v38 = vmul.f32 %v2938_v34, %v667_v4  ;;  %2371 = vmatmul.msk.bf16.vlgmr.msra.gmra.mxu3 %vm1286_vm7, %v1547_v51  ;;  %v943_v51 = vrot.slane %v3240_v48, 1 }
 0x125   : > { %2624 = vrot.lane.b32.xlu2 %v2598_v23, %s2771_s18  ;;  %v759_v23 = vadd.s32 8, %v2941_v36  ;;  %v3278_v27 = vsel %vm862_vm6, 0.0, %v884_v61  ;;  %1708 = vmatpush.bf16.msra.mxu1 %v2405_v22 }
 0x126   : > { %v723_v12 = vadd.f32 %v2946_v39, %v699_v38  ;;  %1757 = vmatpush.bf16.msra.mxu2 %v2413_v40 }
 0x127   : > { %v2293_v38 = vadd.s32 4294967295, %v759_v23 }
 0x128   : > { %v743_v31 = vmax.f32 %v723_v12, 0.0  ;;  %2629 = vrot.lane.b32.xlu1 %v2628_v24, %s2770_s30  ;;  %2619 = vrot.lane.b32.xlu0 %v3161_v33, %s2770_s30 }
 0x129   : > { %vm778_vm10 = vcmp.ge.s32.totalorder %v2293_v38, 0  ;;  %vm788_vm11 = vcmp.lt.s32.totalorder %v2293_v38, 16 }
 0x12a   : > { %v3256_v63 = vsel %vm817_vm9, %v743_v31, 0.0  ;;  %v3293_v22 = vpop.permute.xlu2 %2489  ;;  %vm798_vm12 = vmand %vm778_vm10, %vm788_vm11 }
 0x12b   : > { %v670_v42 = vpop.f32.mrf.mxu0  ;;  %v3266_v33 = vpack.i.bf16 %v3256_v63, %v3240_v48  ;;  %v885_v8 = vrot.slane %v3256_v63, 7  ;;  %v944_v12 = vrot.slane %v3256_v63, 1  ;;  %vm819_vm13 = vmand %vm798_vm12, %vm801_vm3 }
 0x12c   : > { %v700_v4 = vmul.f32 %v2938_v34, %v670_v42 }
 0x12d   : > { %2639 = vrot.lane.b32.xlu2 %v3266_v33, %s2772_s20  ;;  %v3275_v17 = vsel %vm862_vm6, %v884_v61, %v885_v8  ;;  %v945_v23 = vsel %vm921_vm5, %v943_v51, %v944_v12  ;;  %v977_v42 = vsel %vm921_vm5, %v944_v12, 0.0  ;;  %v2404_v8 = vld [vmem:[%s3742_s6 + $0x18] sm:$0xff] }
 0x12e   : > { %v724_v31 = vadd.f32 %v2946_v39, %v700_v4  ;;  %v3283_v13 = vpack.i.bf16 %v3275_v17, %v3278_v27  ;;  %v2412_v61 = vld [vmem:[%s3742_s6 + $0x58] sm:$0xff]  ;;  %v1406_v4 = vpack.c.bf16 %v945_v23, %v945_v23  ;;  %v1408_v14 = vpack.c.bf16 %v977_v42, %v977_v42  ;;  %1709 = vmatpush.bf16.msra.mxu1 %v2404_v8 }
 0x12f   : > { %1758 = vmatpush.bf16.msra.mxu2 %v2412_v61  ;;  %v2658_v8 = vpack.i.bf16 %v977_v42, %v945_v23  ;;  %v2402_v61 = vld [vmem:[%s3742_s6 + $0x8] sm:$0xff]  ;;  %v2401_v42 = vld [vmem:[%s3742_s6] sm:$0xff] }
 0x130   : > { %2634 = vrot.lane.b32.xlu1 %v2613_v2, %s2772_s20  ;;  %2644 = vrot.lane.b32.xlu0 %v3283_v13, %s2771_s18  ;;  %v1517_v40 = vunpack.c.l.b16 %v1406_v4  ;;  %v1520_v51 = vunpack.c.l.b16 %v1408_v14  ;;  %v744_v12 = vmax.f32 %v724_v31, 0.0  ;;  %v2410_v4 = vld [vmem:[%s3742_s6 + $0x48] sm:$0xff] }
 0x132   : > { %v1550_v54 = vpack.c.b16 %v1520_v51, %v1517_v40  ;;  %v3307_v14 = vsel %vm798_vm12, %v744_v12, 0.0  ;;  %1710 = vmatpush.bf16.msra.mxu1 %v2403_v30 }
 0x133   : > { %v672_v38 = vpop.f32.mrf.mxu0  ;;  %1759 = vmatpush.bf16.msra.mxu2 %v2411_v60  ;;  %v760_v60 = vadd.s32 9, %v2941_v36  ;;  %v887_v30 = vrot.slane %v3307_v14, 7  ;;  %v946_v40 = vrot.slane %v3307_v14, 1 }
 0x134   : > { %v701_v2 = vmul.f32 %v2938_v34, %v672_v38  ;;  %2372 = vmatmul.msk.bf16.gmra.mxu3 %vm1286_vm7, %v1550_v54 }
 0x135   : > { %2654 = vrot.lane.b32.xlu2 %v2628_v24, %s2771_s18 }
 0x136   : > { %v725_v31 = vadd.f32 %v2946_v39, %v701_v2  ;;  %1711 = vmatpush.bf16.msra.mxu1 %v2402_v61 }
 0x137   : > { %v3318_v54 = vpop.permute.xlu2 %2494  ;;  %1760 = vmatpush.bf16.msra.mxu2 %v2410_v4  ;;  %v919_v4 = vsel %vm862_vm6, 0.0, %v887_v30 }
 0x138   : > { %v745_v24 = vmax.f32 %v725_v31, 0.0  ;;  %2659 = vrot.lane.b32.xlu1 %v2658_v8, %s2770_s30  ;;  %2649 = vrot.lane.b32.xlu0 %v3205_v41, %s2770_s30  ;;  %v2409_v41 = vld [vmem:[%s3742_s6 + $0x40] sm:$0xff]  ;;  %v2294_v31 = vadd.s32 4294967295, %v760_v60 }
 0x13a   : > { %v3325_v23 = vsel %vm819_vm13, %v745_v24, 0.0  ;;  %1712 = vmatpush.bf16.msra.mxu1 %v2401_v42  ;;  %vm779_vm14 = vcmp.ge.s32.totalorder %v2294_v31, 0  ;;  %vm789_vm15 = vcmp.lt.s32.totalorder %v2294_v31, 16 }
 0x13b   : > { %v888_v51 = vrot.slane %v3325_v23, 7  ;;  %v947_v12 = vrot.slane %v3325_v23, 1  ;;  %v675_v38 = vpop.f32.mrf.mxu0  ;;  %v2668_v36 = vpack.i.bf16 %v3325_v23, %v3307_v14  ;;  %1761 = vmatpush.bf16.msra.mxu2 %v2409_v41  ;;  %vm799_vm0 = vmand %vm779_vm14, %vm789_vm15 }
 0x13c   : > { %v702_v2 = vmul.f32 %v2938_v34, %v675_v38  ;;  %v2470_v38 = vpop.permute.xlu0 %2469  ;;  %vm821_vm1 = vmand %vm799_vm0, %vm801_vm3  ;;  %vm1303_vm3 = vcmask 523264  }
 0x13d   : > { %2669 = vrot.lane.b32.xlu2 %v2668_v36, %s2772_s20  ;;  %v889_v61 = vsel %vm862_vm6, %v887_v30, %v888_v51  ;;  %v948_v24 = vsel %vm921_vm5, %v946_v40, %v947_v12  ;;  %v978_v1 = vsel %vm921_vm5, %v947_v12, 0.0  ;;  %v2471_v31 = vunpack.i.l.bf16 %v2470_v38 }
 0x13e   : > { %v726_v3 = vadd.f32 %v2946_v39, %v702_v2  ;;  %v2673_v9 = vpack.i.bf16 %v889_v61, %v919_v4  ;;  %v1410_v10 = vpack.c.bf16 %v948_v24, %v948_v24  ;;  %v1412_v26 = vpack.c.bf16 %v978_v1, %v978_v1  ;;  %1809 = vmatpush.bf16.msrb.mxu1 %v3115_v55 }
 0x13f   : > { %v3345_v25 = vpop.permute.xlu2 %2504  ;;  %2421 = vmatpush.bf16.msrb.mxu2 %v3115_v55 }
 0x140   : > { %2664 = vrot.lane.b32.xlu1 %v3283_v13, %s2772_s20  ;;  %2674 = vrot.lane.b32.xlu0 %v2673_v9, %s2771_s18  ;;  %v1523_v60 = vunpack.c.l.b16 %v1410_v10  ;;  %v1526_v30 = vunpack.c.l.b16 %v1412_v26  ;;  %v746_v40 = vmax.f32 %v726_v3, 0.0  ;;  %v2688_v10 = vpack.i.bf16 %v978_v1, %v948_v24  ;;  %v2480_v3 = vpop.permute.xlu1 %2479 }
 0x141   : > { %v2472_v1 = vunpack.i.h.bf16 %v2470_v38  ;;  %v2481_v61 = vunpack.i.l.bf16 %v2480_v3 }
 0x142   : > { %v1553_v42 = vpack.c.b16 %v1526_v30, %v1523_v60  ;;  %1810 = vmatpush.bf16.msrb.mxu1 %v3136_v7  ;;  %v840_v13 = vsel %vm799_vm0, %v746_v40, 0.0 }
 0x143   : > { %v677_v51 = vpop.f32.mrf.mxu0  ;;  %2423 = vmatpush.bf16.msrb.mxu2 %v3136_v7  ;;  %v949_v41 = vrot.slane %v840_v13, 1 }
 0x144   : > { %v703_v12 = vmul.f32 %v2938_v34, %v677_v51  ;;  %2373 = vmatmul.msk.bf16.gmra.mxu3 %vm1286_vm7, %v1553_v42  ;;  %v890_v34 = vrot.slane %v840_v13, 7  ;;  %v2475_v44 = vpop.permute.xlu0 %2474  ;;  %v2482_v51 = vunpack.i.h.bf16 %v2480_v3  ;;  %v2492_v3 = vunpack.i.h.bf16 %v3293_v22 }
 0x145   : > { %2684 = vrot.lane.b32.xlu2 %v2658_v8, %s2771_s18 }
 0x146   : > { %v727_v36 = vadd.f32 %v2946_v39, %v703_v12  ;;  %v920_v24 = vsel %vm862_vm6, 0.0, %v890_v34  ;;  %v3765_v12 = vrot.slane %v2963_v49, 7  ;;  %v1288_v49 = vsel %vm1286_vm7, %v2975_v0, %v2472_v1 }
 0x147   : > { %v3360_v26 = vpop.permute.xlu2 %2519 }
 0x148   : > { %v747_v55 = vmax.f32 %v727_v36, 0.0  ;;  %2689 = vrot.lane.b32.xlu1 %v2688_v10, %s2770_s30  ;;  %2679 = vrot.lane.b32.xlu0 %v3266_v33, %s2770_s30  ;;  %v911_v38 = vsel %vm862_vm6, 0.0, %v3765_v12  ;;  %v2476_v36 = vunpack.i.l.bf16 %v2475_v44 }
 0x14a   : > { %v841_v8 = vsel %vm821_vm1, %v747_v55, 0.0  ;;  %v1287_v55 = vsel %vm1286_vm7, %v911_v38, %v2471_v31  ;;  %v2497_v31 = vunpack.i.h.bf16 %v3318_v54 }
 0x14b   : > { %v891_v2 = vrot.slane %v841_v8, 7  ;;  %v950_v39 = vrot.slane %v841_v8, 1  ;;  %v2703_v7 = vpack.i.bf16 %v841_v8, %v840_v13  ;;  %v2477_v13 = vunpack.i.h.bf16 %v2475_v44 }
 0x14c   : > { %v2500_v38 = vpop.permute.xlu0 %2499 }
 0x14d   : > { %v892_v4 = vsel %vm862_vm6, %v890_v34, %v891_v2  ;;  %v951_v60 = vsel %vm921_vm5, %v949_v41, %v950_v39  ;;  %2704 = vrot.lane.b32.xlu2 %v2703_v7, %s2772_s20  ;;  %v979_v30 = vsel %vm921_vm5, %v950_v39, 0.0  ;;  %vm1320_vm5 = vcmask 785408  }
 0x14e   : > { %v2693_v33 = vpack.i.bf16 %v892_v4, %v920_v24  ;;  %v1414_v40 = vpack.c.bf16 %v951_v60, %v951_v60  ;;  %v1416_v42 = vpack.c.bf16 %v979_v30, %v979_v30  ;;  %v2491_v41 = vunpack.i.l.bf16 %v3293_v22 }
 0x14f   : > { %v3376_v34 = vpop.permute.xlu2 %2534  ;;  %v1304_v2 = vsel %vm1303_vm3, %v1287_v55, %v2481_v61  ;;  %v2496_v24 = vunpack.i.l.bf16 %v3318_v54  ;;  %v1338_v60 = vsel %vm1286_vm7, %v2989_v11, %v2477_v13  ;;  %v1337_v22 = vsel %vm1286_vm7, %v2982_v6, %v2476_v36 }
 0x150   : > { %2699 = vrot.lane.b32.xlu1 %v2673_v9, %s2772_s20  ;;  %2694 = vrot.lane.b32.xlu0 %v2693_v33, %s2771_s18  ;;  %v1529_v10 = vunpack.c.l.b16 %v1414_v40  ;;  %v1532_v8 = vunpack.c.l.b16 %v1416_v42  ;;  %v1305_v9 = vsel %vm1303_vm3, %v1288_v49, %v2482_v51  ;;  %v1321_v61 = vsel %vm1320_vm5, %v1304_v2, %v2491_v41 }
 0x151   : > { %v1322_v33 = vsel %vm1320_vm5, %v1305_v9, %v2492_v3  ;;  %v2501_v41 = vunpack.i.l.bf16 %v2500_v38  ;;  %v2507_v9 = vunpack.i.h.bf16 %v3345_v25 }
 0x152   : > { %v2485_v39 = vpop.permute.xlu1 %2484  ;;  %v1556_v4 = vpack.c.b16 %v1532_v8, %v1529_v10  ;;  %v2502_v8 = vunpack.i.h.bf16 %v2500_v38 }
 0x153   : > { %v2487_v7 = vunpack.i.h.bf16 %v2485_v39  ;;  %v2486_v44 = vunpack.i.l.bf16 %v2485_v39  ;;  %v1289_v2 = vsel %vm1286_vm7, %v3001_v21, %v2501_v41 }
 0x154   : > { %2374 = vmatmul.msk.bf16.gmra.mxu3 %vm1286_vm7, %v1556_v4  ;;  %v1290_v39 = vsel %vm1286_vm7, %v2998_v20, %v2502_v8  ;;  %v2521_v4 = vunpack.i.l.bf16 %v3360_v26 }
 0x155   : > { %v1354_v0 = vsel %vm1303_vm3, %v1338_v60, %v2487_v7  ;;  %v1353_v1 = vsel %vm1303_vm3, %v1337_v22, %v2486_v44  ;;  %v2506_v7 = vunpack.i.l.bf16 %v3345_v25  ;;  %v2522_v44 = vunpack.i.h.bf16 %v3360_v26 }
 0x156   : > { %v1369_v30 = vsel %vm1320_vm5, %v1353_v1, %v2496_v24  ;;  %v1370_v54 = vsel %vm1320_vm5, %v1354_v0, %v2497_v31  ;;  %v1307_v25 = vsel %vm1303_vm3, %v1290_v39, %v2507_v9 }
 0x157   : > { %v1385_v40 = vpack.c.bf16 %v1369_v30, %v1321_v61  ;;  %v1387_v51 = vpack.c.bf16 %v1370_v54, %v1322_v33  ;;  %v3397_v36 = vpop.permute.xlu2 %2549  ;;  %v1306_v61 = vsel %vm1303_vm3, %v1289_v2, %v2506_v7 }
 0x159   : > { %v1485_v11 = vunpack.c.l.b16 %v1385_v40  ;;  %v1488_v42 = vunpack.c.l.b16 %v1387_v51  ;;  %v1486_v12 = vunpack.c.h.b16 %v1385_v40  ;;  %v1489_v6 = vunpack.c.h.b16 %v1387_v51 }
 0x15a   : > { %v2510_v13 = vpop.permute.xlu1 %2509 }
 0x15b   : > { %v1533_v10 = vpack.c.b16 %v1488_v42, %v1485_v11  ;;  %v1534_v55 = vpack.c.b16 %v1489_v6, %v1486_v12  ;;  %v2512_v3 = vunpack.i.h.bf16 %v2510_v13  ;;  %v2511_v49 = vunpack.i.l.bf16 %v2510_v13 }
 0x15d   : > { %1713 = vmatmul.bf16.vlgmr.msra.gmra.mxu1 %v1533_v10  ;;  %1762 = vmatmul.bf16.vlgmr.msra.gmra.mxu2 %v1534_v55  ;;  %v1340_v21 = vsel %vm1286_vm7, %v3019_v35, %v2512_v3  ;;  %v1339_v20 = vsel %vm1286_vm7, %v3009_v28, %v2511_v49 }
 0x15f   : > { %v3413_v33 = vpop.permute.xlu2 %2564 }
 0x162   : > { %v2515_v31 = vpop.permute.xlu1 %2514  ;;  %v2525_v24 = vpop.permute.xlu0 %2524 }
 0x163   : > { %v2517_v60 = vunpack.i.h.bf16 %v2515_v31  ;;  %v2516_v22 = vunpack.i.l.bf16 %v2515_v31  ;;  %v2527_v0 = vunpack.i.h.bf16 %v2525_v24  ;;  %v2526_v1 = vunpack.i.l.bf16 %v2525_v24 }
 0x164   : > { %v2552_v31 = vunpack.i.h.bf16 %v3397_v36  ;;  %v2551_v24 = vunpack.i.l.bf16 %v3397_v36 }
 0x165   : > { %v1324_v26 = vsel %vm1320_vm5, %v1307_v25, %v2517_v60  ;;  %v1323_v30 = vsel %vm1320_vm5, %v1306_v61, %v2516_v22  ;;  %v1356_v54 = vsel %vm1303_vm3, %v1340_v21, %v2527_v0  ;;  %v1355_v40 = vsel %vm1303_vm3, %v1339_v20, %v2526_v1 }
 0x166   : > { %v1371_v51 = vsel %vm1320_vm5, %v1355_v40, %v2521_v4  ;;  %v1372_v35 = vsel %vm1320_vm5, %v1356_v54, %v2522_v44  ;;  %v2537_v44 = vunpack.i.h.bf16 %v3376_v34  ;;  %v2536_v4 = vunpack.i.l.bf16 %v3376_v34 }
 0x167   : > { %v1389_v11 = vpack.c.bf16 %v1371_v51, %v1323_v30  ;;  %v1391_v28 = vpack.c.bf16 %v1372_v35, %v1324_v26  ;;  %v3421_v49 = vpop.permute.xlu2 %2579 }
 0x169   : > { %v1491_v42 = vunpack.c.l.b16 %v1389_v11  ;;  %v1494_v12 = vunpack.c.l.b16 %v1391_v28  ;;  %v1492_v6 = vunpack.c.h.b16 %v1389_v11  ;;  %v1495_v38 = vunpack.c.h.b16 %v1391_v28 }
 0x16a   : > { %v2540_v13 = vpop.permute.xlu1 %2539  ;;  %v2530_v10 = vpop.permute.xlu0 %2529 }
 0x16b   : > { %v1536_v55 = vpack.c.b16 %v1494_v12, %v1491_v42  ;;  %v1537_v8 = vpack.c.b16 %v1495_v38, %v1492_v6  ;;  %v2532_v41 = vunpack.i.h.bf16 %v2530_v10  ;;  %v2531_v3 = vunpack.i.l.bf16 %v2530_v10 }
 0x16c   : > { %v2542_v2 = vunpack.i.h.bf16 %v2540_v13  ;;  %v2541_v39 = vunpack.i.l.bf16 %v2540_v13 }
 0x16d   : > { %1718 = vmatmul.bf16.gmra.mxu1 %v1536_v55  ;;  %1767 = vmatmul.bf16.gmra.mxu2 %v1537_v8  ;;  %v1292_v9 = vsel %vm1286_vm7, %v3032_v46, %v2532_v41  ;;  %v1291_v7 = vsel %vm1286_vm7, %v3035_v47, %v2531_v3 }
 0x16e   : > { %v1342_v46 = vsel %vm1286_vm7, %v3059_v5, %v2542_v2  ;;  %v1341_v47 = vsel %vm1286_vm7, %v3051_v62, %v2541_v39  ;;  %v1308_v61 = vsel %vm1303_vm3, %v1291_v7, %v2536_v4  ;;  %v1309_v34 = vsel %vm1303_vm3, %v1292_v9, %v2537_v44 }
 0x16f   : > { %v3443_v35 = vpop.permute.xlu2 %2594  ;;  %v2567_v39 = vunpack.i.h.bf16 %v3413_v33  ;;  %v2566_v9 = vunpack.i.l.bf16 %v3413_v33  ;;  %v2582_v7 = vunpack.i.h.bf16 %v3421_v49  ;;  %v2581_v44 = vunpack.i.l.bf16 %v3421_v49 }
 0x172   : > { %v2545_v60 = vpop.permute.xlu1 %2544  ;;  %v2555_v22 = vpop.permute.xlu0 %2554 }
 0x173   : > { %v2547_v0 = vunpack.i.h.bf16 %v2545_v60  ;;  %v2546_v1 = vunpack.i.l.bf16 %v2545_v60  ;;  %v2557_v21 = vunpack.i.h.bf16 %v2555_v22  ;;  %v2556_v20 = vunpack.i.l.bf16 %v2555_v22 }
 0x175   : > { %v1325_v25 = vsel %vm1320_vm5, %v1308_v61, %v2546_v1  ;;  %v1326_v36 = vsel %vm1320_vm5, %v1309_v34, %v2547_v0  ;;  %v1358_v26 = vsel %vm1303_vm3, %v1342_v46, %v2557_v21  ;;  %v1357_v30 = vsel %vm1303_vm3, %v1341_v47, %v2556_v20 }
 0x176   : > { %v1373_v54 = vsel %vm1320_vm5, %v1357_v30, %v2551_v24  ;;  %v1374_v40 = vsel %vm1320_vm5, %v1358_v26, %v2552_v31 }
 0x177   : > { %v1393_v5 = vpack.c.bf16 %v1373_v54, %v1325_v25  ;;  %v1395_v51 = vpack.c.bf16 %v1374_v40, %v1326_v36  ;;  %v2610_v24 = vpop.permute.xlu2 %2609 }
 0x179   : > { %v1497_v62 = vunpack.c.l.b16 %v1393_v5  ;;  %v1500_v11 = vunpack.c.l.b16 %v1395_v51  ;;  %v1498_v28 = vunpack.c.h.b16 %v1393_v5  ;;  %v1501_v42 = vunpack.c.h.b16 %v1395_v51 }
 0x17a   : > { %v2570_v12 = vpop.permute.xlu1 %2569  ;;  %v2560_v6 = vpop.permute.xlu0 %2559 }
 0x17b   : > { %v1539_v38 = vpack.c.b16 %v1500_v11, %v1497_v62  ;;  %v1540_v13 = vpack.c.b16 %v1501_v42, %v1498_v28  ;;  %v2562_v10 = vunpack.i.h.bf16 %v2560_v6  ;;  %v2561_v55 = vunpack.i.l.bf16 %v2560_v6 }
 0x17c   : > { %v2572_v8 = vunpack.i.h.bf16 %v2570_v12  ;;  %v2571_v41 = vunpack.i.l.bf16 %v2570_v12 }
 0x17d   : > { %1723 = vmatmul.bf16.gmra.mxu1 %v1539_v38  ;;  %1772 = vmatmul.bf16.gmra.mxu2 %v1540_v13  ;;  %v1294_v3 = vsel %vm1286_vm7, %v3072_v15, %v2562_v10  ;;  %v1293_v2 = vsel %vm1286_vm7, %v3075_v16, %v2561_v55  ;;  %v2597_v13 = vunpack.i.h.bf16 %v3443_v35  ;;  %v2596_v10 = vunpack.i.l.bf16 %v3443_v35 }
 0x17e   : > { %v1344_v15 = vsel %vm1286_vm7, %v3102_v43, %v2572_v8  ;;  %v1343_v16 = vsel %vm1286_vm7, %v3092_v32, %v2571_v41  ;;  %v1310_v21 = vsel %vm1303_vm3, %v1293_v2, %v2566_v9  ;;  %v1311_v33 = vsel %vm1303_vm3, %v1294_v3, %v2567_v39 }
 0x17f   : > { %v3465_v62 = vpop.permute.xlu2 %2624  ;;  %v2612_v55 = vunpack.i.h.bf16 %v2610_v24  ;;  %v2611_v8 = vunpack.i.l.bf16 %v2610_v24 }
 0x182   : > { %v2575_v4 = vpop.permute.xlu1 %2574  ;;  %v2585_v31 = vpop.permute.xlu0 %2584 }
 0x183   : > { %v2577_v60 = vunpack.i.h.bf16 %v2575_v4  ;;  %v2576_v22 = vunpack.i.l.bf16 %v2575_v4  ;;  %v2587_v0 = vunpack.i.h.bf16 %v2585_v31  ;;  %v2586_v1 = vunpack.i.l.bf16 %v2585_v31 }
 0x185   : > { %v1327_v20 = vsel %vm1320_vm5, %v1310_v21, %v2576_v22  ;;  %v1328_v49 = vsel %vm1320_vm5, %v1311_v33, %v2577_v60  ;;  %v1360_v46 = vsel %vm1303_vm3, %v1344_v15, %v2587_v0  ;;  %v1359_v47 = vsel %vm1303_vm3, %v1343_v16, %v2586_v1 }
 0x186   : > { %v1375_v61 = vsel %vm1320_vm5, %v1359_v47, %v2581_v44  ;;  %v1376_v34 = vsel %vm1320_vm5, %v1360_v46, %v2582_v7 }
 0x187   : > { %v1397_v43 = vpack.c.bf16 %v1375_v61, %v1327_v20  ;;  %v1399_v25 = vpack.c.bf16 %v1376_v34, %v1328_v49 }
 0x189   : > { %v1503_v36 = vunpack.c.l.b16 %v1397_v43  ;;  %v1506_v32 = vunpack.c.l.b16 %v1399_v25  ;;  %v1504_v26 = vunpack.c.h.b16 %v1397_v43  ;;  %v1507_v30 = vunpack.c.h.b16 %v1399_v25 }
 0x18a   : > { %v2600_v54 = vpop.permute.xlu1 %2599  ;;  %v2590_v40 = vpop.permute.xlu0 %2589 }
 0x18b   : > { %v1542_v5 = vpack.c.b16 %v1506_v32, %v1503_v36  ;;  %v1543_v51 = vpack.c.b16 %v1507_v30, %v1504_v26  ;;  %v2592_v11 = vunpack.i.h.bf16 %v2590_v40  ;;  %v2591_v28 = vunpack.i.l.bf16 %v2590_v40 }
 0x18c   : > { %v2602_v42 = vunpack.i.h.bf16 %v2600_v54  ;;  %v2601_v12 = vunpack.i.l.bf16 %v2600_v54  ;;  %v2627_v30 = vunpack.i.h.bf16 %v3465_v62  ;;  %v2626_v54 = vunpack.i.l.bf16 %v3465_v62 }
 0x18d   : > { %1728 = vmatmul.bf16.gmra.mxu1 %v1542_v5  ;;  %1777 = vmatmul.bf16.gmra.mxu2 %v1543_v51  ;;  %v1296_v6 = vsel %vm1286_vm7, %v3120_v58, %v2592_v11  ;;  %v1295_v38 = vsel %vm1286_vm7, %v3123_v59, %v2591_v28 }
 0x18e   : > { %v1346_v44 = vsel %vm1286_vm7, %v3157_v29, %v2602_v42  ;;  %v1345_v58 = vsel %vm1286_vm7, %v3147_v18, %v2601_v12  ;;  %v1312_v59 = vsel %vm1303_vm3, %v1295_v38, %v2596_v10  ;;  %v1313_v4 = vsel %vm1303_vm3, %v1296_v6, %v2597_v13  ;;  %v2640_v29 = vpop.permute.xlu2 %2639 }
 0x18f   : > { %v2642_v40 = vunpack.i.h.bf16 %v2640_v29  ;;  %v2641_v5 = vunpack.i.l.bf16 %v2640_v29 }
 0x192   : > { %v2605_v41 = vpop.permute.xlu1 %2604  ;;  %v2615_v3 = vpop.permute.xlu0 %2614 }
 0x193   : > { %v2607_v2 = vunpack.i.h.bf16 %v2605_v41  ;;  %v2606_v39 = vunpack.i.l.bf16 %v2605_v41  ;;  %v2617_v9 = vunpack.i.h.bf16 %v2615_v3  ;;  %v2616_v7 = vunpack.i.l.bf16 %v2615_v3 }
 0x195   : > { %v1329_v35 = vsel %vm1320_vm5, %v1312_v59, %v2606_v39  ;;  %v1330_v31 = vsel %vm1320_vm5, %v1313_v4, %v2607_v2  ;;  %v1362_v24 = vsel %vm1303_vm3, %v1346_v44, %v2617_v9  ;;  %v1361_v60 = vsel %vm1303_vm3, %v1345_v58, %v2616_v7 }
 0x196   : > { %v1377_v22 = vsel %vm1320_vm5, %v1361_v60, %v2611_v8  ;;  %v1378_v0 = vsel %vm1320_vm5, %v1362_v24, %v2612_v55  ;;  %v2655_v36 = vpop.permute.xlu2 %2654 }
 0x197   : > { %v1401_v1 = vpack.c.bf16 %v1377_v22, %v1329_v35  ;;  %v1403_v15 = vpack.c.bf16 %v1378_v0, %v1330_v31 }
 0x199   : > { %v1509_v18 = vunpack.c.l.b16 %v1401_v1  ;;  %v1512_v16 = vunpack.c.l.b16 %v1403_v15  ;;  %v1510_v21 = vunpack.c.h.b16 %v1401_v1  ;;  %v1513_v33 = vunpack.c.h.b16 %v1403_v15 }
 0x19a   : > { %v2630_v20 = vpop.permute.xlu1 %2629  ;;  %v2620_v49 = vpop.permute.xlu0 %2619  ;;  %v2657_v1 = vunpack.i.h.bf16 %v2655_v36  ;;  %v2656_v15 = vunpack.i.l.bf16 %v2655_v36 }
 0x19b   : > { %v1545_v46 = vpack.c.b16 %v1512_v16, %v1509_v18  ;;  %v1546_v47 = vpack.c.b16 %v1513_v33, %v1510_v21  ;;  %v2622_v61 = vunpack.i.h.bf16 %v2620_v49  ;;  %v2621_v34 = vunpack.i.l.bf16 %v2620_v49 }
 0x19c   : > { %v2632_v43 = vunpack.i.h.bf16 %v2630_v20  ;;  %v2631_v25 = vunpack.i.l.bf16 %v2630_v20 }
 0x19d   : > { %1733 = vmatmul.bf16.gmra.mxu1 %v1545_v46  ;;  %1782 = vmatmul.bf16.gmra.mxu2 %v1546_v47  ;;  %v1298_v32 = vsel %vm1286_vm7, %v3170_v45, %v2622_v61  ;;  %v1297_v26 = vsel %vm1286_vm7, %v3173_v50, %v2621_v34 }
 0x19e   : > { %v1348_v38 = vsel %vm1286_vm7, %v3200_v37, %v2632_v43  ;;  %v1347_v45 = vsel %vm1286_vm7, %v3190_v19, %v2631_v25  ;;  %v1314_v50 = vsel %vm1303_vm3, %v1297_v26, %v2626_v54  ;;  %v1315_v13 = vsel %vm1303_vm3, %v1298_v32, %v2627_v30  ;;  %v2670_v59 = vpop.permute.xlu2 %2669 }
 0x19f   : > { %v2672_v18 = vunpack.i.h.bf16 %v2670_v59  ;;  %v2671_v16 = vunpack.i.l.bf16 %v2670_v59 }
 0x1a2   : > { %v2635_v51 = vpop.permute.xlu1 %2634  ;;  %v2645_v11 = vpop.permute.xlu0 %2644 }
 0x1a3   : > { %v2637_v28 = vunpack.i.h.bf16 %v2635_v51  ;;  %v2636_v42 = vunpack.i.l.bf16 %v2635_v51  ;;  %v2647_v12 = vunpack.i.h.bf16 %v2645_v11  ;;  %v2646_v6 = vunpack.i.l.bf16 %v2645_v11 }
 0x1a5   : > { %v1331_v62 = vsel %vm1320_vm5, %v1314_v50, %v2636_v42  ;;  %v1332_v10 = vsel %vm1320_vm5, %v1315_v13, %v2637_v28  ;;  %v1364_v55 = vsel %vm1303_vm3, %v1348_v38, %v2647_v12  ;;  %v1363_v8 = vsel %vm1303_vm3, %v1347_v45, %v2646_v6 }
 0x1a6   : > { %v1379_v41 = vsel %vm1320_vm5, %v1363_v8, %v2641_v5  ;;  %v1380_v3 = vsel %vm1320_vm5, %v1364_v55, %v2642_v40  ;;  %v2685_v43 = vpop.permute.xlu2 %2684 }
 0x1a7   : > { %v1405_v37 = vpack.c.bf16 %v1379_v41, %v1331_v62  ;;  %v1407_v2 = vpack.c.bf16 %v1380_v3, %v1332_v10  ;;  %v2687_v8 = vunpack.i.h.bf16 %v2685_v43  ;;  %v2686_v41 = vunpack.i.l.bf16 %v2685_v43 }
 0x1a9   : > { %v1515_v39 = vunpack.c.l.b16 %v1405_v37  ;;  %v1518_v19 = vunpack.c.l.b16 %v1407_v2  ;;  %v1516_v44 = vunpack.c.h.b16 %v1405_v37  ;;  %v1519_v58 = vunpack.c.h.b16 %v1407_v2 }
 0x1aa   : > { %v2660_v9 = vpop.permute.xlu1 %2659  ;;  %v2650_v7 = vpop.permute.xlu0 %2649 }
 0x1ab   : > { %v1548_v4 = vpack.c.b16 %v1518_v19, %v1515_v39  ;;  %v1549_v35 = vpack.c.b16 %v1519_v58, %v1516_v44  ;;  %v2652_v31 = vunpack.i.h.bf16 %v2650_v7  ;;  %v2651_v24 = vunpack.i.l.bf16 %v2650_v7 }
 0x1ac   : > { %v2662_v60 = vunpack.i.h.bf16 %v2660_v9  ;;  %v2661_v22 = vunpack.i.l.bf16 %v2660_v9 }
 0x1ad   : > { %1738 = vmatmul.bf16.gmra.mxu1 %v1548_v4  ;;  %1787 = vmatmul.bf16.gmra.mxu2 %v1549_v35  ;;  %v1300_v0 = vsel %vm1286_vm7, %v3213_v52, %v2652_v31  ;;  %v1299_v29 = vsel %vm1286_vm7, %v3216_v53, %v2651_v24 }
 0x1ae   : > { %v1350_v61 = vsel %vm1286_vm7, %v3256_v63, %v2662_v60  ;;  %v1349_v34 = vsel %vm1286_vm7, %v3240_v48, %v2661_v22  ;;  %v1316_v52 = vsel %vm1303_vm3, %v1299_v29, %v2656_v15  ;;  %v1317_v53 = vsel %vm1303_vm3, %v1300_v0, %v2657_v1  ;;  %v2705_v50 = vpop.permute.xlu2 %2704 }
 0x1af   : > { %v2707_v3 = vunpack.i.h.bf16 %v2705_v50  ;;  %v2706_v37 = vunpack.i.l.bf16 %v2705_v50 }
 0x1b2   : > { %v2665_v21 = vpop.permute.xlu1 %2664  ;;  %v2675_v33 = vpop.permute.xlu0 %2674 }
 0x1b3   : > { %v2667_v20 = vunpack.i.h.bf16 %v2665_v21  ;;  %v2666_v49 = vunpack.i.l.bf16 %v2665_v21  ;;  %v2677_v46 = vunpack.i.h.bf16 %v2675_v33  ;;  %v2676_v47 = vunpack.i.l.bf16 %v2675_v33 }
 0x1b4   : > { %v3766_v33 = vpack.c.b16 %v3043_v56, %v3045_v57 }
 0x1b5   : > { %v1333_v25 = vsel %vm1320_vm5, %v1316_v52, %v2666_v49  ;;  %v1334_v36 = vsel %vm1320_vm5, %v1317_v53, %v2667_v20  ;;  %v1366_v32 = vsel %vm1303_vm3, %v1350_v61, %v2677_v46  ;;  %v1365_v26 = vsel %vm1303_vm3, %v1349_v34, %v2676_v47  ;;  %v3767_v20 = vld [vmem:[#allocation3_spill] sm:$0xff]  ;;  %v3768_v49 = vld [vmem:[#allocation4_spill] sm:$0xff] }
 0x1b6   : > { %v1381_v30 = vsel %vm1320_vm5, %v1365_v26, %v2671_v16  ;;  %v1382_v63 = vsel %vm1320_vm5, %v1366_v32, %v2672_v18  ;;  %v3769_v46 = vpack.c.b16 %v3767_v20, %v3768_v49 }
 0x1b7   : > { %v1409_v54 = vpack.c.bf16 %v1381_v30, %v1333_v25  ;;  %v1411_v40 = vpack.c.bf16 %v1382_v63, %v1334_v36  ;;  %v3770_v25 = vld [vmem:[#allocation6_spill] sm:$0xff]  ;;  %v3771_v36 = vld [vmem:[#allocation5_spill] sm:$0xff] }
 0x1b8   : > { %v3772_v32 = vpack.c.b16 %v3770_v25, %v3771_v36 }
 0x1b9   : > { %v1521_v48 = vunpack.c.l.b16 %v1409_v54  ;;  %v1524_v5 = vunpack.c.l.b16 %v1411_v40  ;;  %v1522_v51 = vunpack.c.h.b16 %v1409_v54  ;;  %v1525_v11 = vunpack.c.h.b16 %v1411_v40  ;;  %v3773_v40 = vld [vmem:[#allocation8_spill] sm:$0xff] }
 0x1ba   : > { %v2690_v28 = vpop.permute.xlu1 %2689  ;;  %v2680_v42 = vpop.permute.xlu0 %2679 }
 0x1bb   : > { %v1551_v12 = vpack.c.b16 %v1524_v5, %v1521_v48  ;;  %v1552_v6 = vpack.c.b16 %v1525_v11, %v1522_v51  ;;  %v2682_v38 = vunpack.i.h.bf16 %v2680_v42  ;;  %v2681_v45 = vunpack.i.l.bf16 %v2680_v42  ;;  %v3774_v48 = vld [vmem:[#allocation7_spill] sm:$0xff] }
 0x1bc   : > { %v2692_v13 = vunpack.i.h.bf16 %v2690_v28  ;;  %v2691_v62 = vunpack.i.l.bf16 %v2690_v28  ;;  %v3775_v5 = vpack.c.b16 %v3773_v40, %v3774_v48 }
 0x1bd   : > { %1743 = vmatmul.bf16.gmra.mxu1 %v1551_v12  ;;  %1792 = vmatmul.bf16.gmra.mxu2 %v1552_v6  ;;  %v1302_v10 = vsel %vm1286_vm7, %v3275_v17, %v2682_v38  ;;  %v1301_v55 = vsel %vm1286_vm7, %v3278_v27, %v2681_v45  ;;  %v2420_v38 = vld [vmem:[%s3745_s9 + $0x8] sm:$0xff] }
 0x1be   : > { %v1352_v58 = vsel %vm1286_vm7, %v3325_v23, %v2692_v13  ;;  %v1351_v59 = vsel %vm1286_vm7, %v3307_v14, %v2691_v62  ;;  %v1318_v17 = vsel %vm1303_vm3, %v1301_v55, %v2686_v41  ;;  %v1319_v27 = vsel %vm1303_vm3, %v1302_v10, %v2687_v8  ;;  %1962 = vmatpush.bf16.msrb.mxu3 %v2420_v38  ;;  %v1832_v62 = vpop.f32.mrf.mxu3 }
 0x1c2   : > { %v2700_v2 = vpop.permute.xlu1 %2699  ;;  %v2695_v39 = vpop.permute.xlu0 %2694 }
 0x1c3   : > { %v2702_v19 = vunpack.i.h.bf16 %v2700_v2  ;;  %v2701_v9 = vunpack.i.l.bf16 %v2700_v2  ;;  %v2697_v7 = vunpack.i.h.bf16 %v2695_v39  ;;  %v2696_v44 = vunpack.i.l.bf16 %v2695_v39 }
 0x1c5   : > { %v1335_v4 = vsel %vm1320_vm5, %v1318_v17, %v2701_v9  ;;  %v1336_v35 = vsel %vm1320_vm5, %v1319_v27, %v2702_v19  ;;  %v1368_v31 = vsel %vm1303_vm3, %v1352_v58, %v2697_v7  ;;  %v1367_v24 = vsel %vm1303_vm3, %v1351_v59, %v2696_v44  ;;  %v3573_v19 = vld [vmem:[%s3743_s7] ss:$0 sm:$0xff] }
 0x1c6   : > { %v1383_v60 = vsel %vm1320_vm5, %v1367_v24, %v2706_v37  ;;  %v1384_v22 = vsel %vm1320_vm5, %v1368_v31, %v2707_v3  ;;  %v1834_v41 = vpop.f32.mrf.mxu3  ;;  %v3579_v59 = vld [vmem:[%s3744_s8] ss:$0 sm:$0xff] }
 0x1c7   : > { %v1413_v23 = vpack.c.bf16 %v1383_v60, %v1335_v4  ;;  %v1415_v0 = vpack.c.bf16 %v1384_v22, %v1336_v35  ;;  %v2419_v35 = vld [vmem:[%s3745_s9] sm:$0xff] }
 0x1c8   : > { %1963 = vmatpush.bf16.msrb.mxu3 %v2419_v35 }
 0x1c9   : > { %v1527_v29 = vunpack.c.l.b16 %v1413_v23  ;;  %v1530_v14 = vunpack.c.l.b16 %v1415_v0  ;;  %v1528_v1 = vunpack.c.h.b16 %v1413_v23  ;;  %v1531_v15 = vunpack.c.h.b16 %v1415_v0 }
 0x1cb   : > { %v1554_v18 = vpack.c.b16 %v1530_v14, %v1527_v29  ;;  %v1555_v16 = vpack.c.b16 %v1531_v15, %v1528_v1 }
 0x1cd   : > { %1748 = vmatmul.bf16.gmra.mxu1 %v1554_v18  ;;  %1797 = vmatmul.bf16.gmra.mxu2 %v1555_v16 }
 0x1ce   : > { %v1837_v9 = vpop.f32.mrf.mxu3 }
 0x1d6   : > { %v1839_v29 = vpop.f32.mrf.mxu3 }
 0x1da   : > { %v1714_v21 = vpop.f32.mrf.mxu1 }
 0x1dd   : > { %2367 = vmatmul.msk.bf16.vlgmr.msrb.gmra.mxu1 %vm1286_vm7, %v3766_v33  ;;  %2368 = vmatmul.msk.bf16.vlgmr.msrb.gmra.mxu2 %vm1286_vm7, %v3769_v46 }
 0x1de   : > { %v1842_v49 = vpop.f32.mrf.mxu3 }
 0x1e0   : > { %v1763_v47 = vpop.f32.mrf.mxu2 }
 0x1e1   : > { %v3543_v61 = vadd.f32 %v1763_v47, %v1714_v21 }
 0x1e2   : > { %v1716_v34 = vpop.f32.mrf.mxu1 }
 0x1e8   : > { %v1765_v52 = vpop.f32.mrf.mxu2 }
 0x1e9   : > { %v3545_v53 = vadd.f32 %v1765_v52, %v1716_v34 }
 0x1ea   : > { %v1719_v43 = vpop.f32.mrf.mxu1 }
 0x1ed   : > { %2369 = vmatmul.msk.bf16.gmra.mxu2 %vm1286_vm7, %v3772_v32 }
 0x1f0   : > { %v1768_v56 = vpop.f32.mrf.mxu2 }
 0x1f1   : > { %v3551_v57 = vadd.f32 %v1768_v56, %v1719_v43 }
 0x1f2   : > { %v1721_v26 = vpop.f32.mrf.mxu1 }
 0x1f8   : > { %v1770_v30 = vpop.f32.mrf.mxu2 }
 0x1f9   : > { %v3553_v63 = vadd.f32 %v1770_v30, %v1721_v26  ;;  %v1844_v30 = vpop.f32.mrf.mxu3 }
 0x1fa   : > { %v1724_v54 = vpop.f32.mrf.mxu1 }
 0x1fd   : > { %2370 = vmatmul.msk.bf16.gmra.mxu2 %vm1286_vm7, %v3775_v5 }
 0x200   : > { %v1773_v51 = vpop.f32.mrf.mxu2 }
 0x201   : > { %v3559_v11 = vadd.f32 %v1773_v51, %v1724_v54  ;;  %v1847_v38 = vpop.f32.mrf.mxu3 }
 0x202   : > { %v1726_v28 = vpop.f32.mrf.mxu1 }
 0x208   : > { %v1775_v42 = vpop.f32.mrf.mxu2 }
 0x209   : > { %v3561_v12 = vadd.f32 %v1775_v42, %v1726_v28 }
 0x20a   : > { %v1729_v6 = vpop.f32.mrf.mxu1 }
 0x210   : > { %v1778_v45 = vpop.f32.mrf.mxu2 }
 0x211   : > { %v3566_v50 = vadd.f32 %v1778_v45, %v1729_v6 }
 0x212   : > { %v1731_v13 = vpop.f32.mrf.mxu1 }
 0x218   : > { %v1780_v10 = vpop.f32.mrf.mxu2 }
 0x219   : > { %v3568_v55 = vadd.f32 %v1780_v10, %v1731_v13 }
 0x21a   : > { %v1734_v8 = vpop.f32.mrf.mxu1 }
 0x220   : > { %v1783_v3 = vpop.f32.mrf.mxu2 }
 0x221   : > { %v1784_v37 = vadd.f32 %v1783_v3, %v1734_v8 }
 0x222   : > { %v1736_v2 = vpop.f32.mrf.mxu1 }
 0x223   : > { %v1833_v39 = vadd.f32 %v1832_v62, %v1784_v37 }
 0x225   : > { %v1864_v44 = vmul.f32 %v3573_v19, %v1833_v39 }
 0x227   : > { %v1884_v31 = vadd.f32 %v3579_v59, %v1864_v44 }
 0x228   : > { %v1785_v7 = vpop.f32.mrf.mxu2 }
 0x229   : > { %v1786_v58 = vadd.f32 %v1785_v7, %v1736_v2  ;;  %v1900_v23 = vmax.f32 %v1884_v31, 0.0 }
 0x22a   : > { %v1739_v17 = vpop.f32.mrf.mxu1 }
 0x22b   : > { %v1835_v27 = vadd.f32 %v1834_v41, %v1786_v58 }
 0x22d   : > { %v1865_v4 = vmul.f32 %v3573_v19, %v1835_v27 }
 0x22f   : > { %v1885_v24 = vadd.f32 %v3579_v59, %v1865_v4 }
 0x230   : > { %v1788_v60 = vpop.f32.mrf.mxu2 }
 0x231   : > { %v1789_v22 = vadd.f32 %v1788_v60, %v1739_v17  ;;  %v1901_v0 = vmax.f32 %v1885_v24, 0.0 }
 0x232   : > { %v1741_v14 = vpop.f32.mrf.mxu1 }
 0x233   : > { %v3587_v1 = vpack.c.bf16 %v1901_v0, %v1900_v23  ;;  %v1838_v15 = vadd.f32 %v1837_v9, %v1789_v22  ;;  %v1849_v9 = vpop.f32.mrf.mxu3 }
 0x235   : > { %v1866_v16 = vmul.f32 %v3573_v19, %v1838_v15 }
 0x237   : > { %v1886_v47 = vadd.f32 %v3579_v59, %v1866_v16 }
 0x238   : > { %v1790_v18 = vpop.f32.mrf.mxu2 }
 0x239   : > { %v1791_v21 = vadd.f32 %v1790_v18, %v1741_v14  ;;  %v1902_v25 = vmax.f32 %v1886_v47, 0.0 }
 0x23a   : > { %v1744_v33 = vpop.f32.mrf.mxu1 }
 0x23b   : > { %v1840_v20 = vadd.f32 %v1839_v29, %v1791_v21 }
 0x23d   : > { %v1867_v46 = vmul.f32 %v3573_v19, %v1840_v20 }
 0x23f   : > { %v1887_v34 = vadd.f32 %v3579_v59, %v1867_v46 }
 0x240   : > { %v1793_v52 = vpop.f32.mrf.mxu2 }
 0x241   : > { %v1794_v43 = vadd.f32 %v1793_v52, %v1744_v33  ;;  %v1903_v36 = vmax.f32 %v1887_v34, 0.0 }
 0x242   : > { %v1746_v32 = vpop.f32.mrf.mxu1 }
 0x243   : > { %v3593_v56 = vpack.c.bf16 %v1903_v36, %v1902_v25  ;;  %v1843_v26 = vadd.f32 %v1842_v49, %v1794_v43 }
 0x245   : > { %v1868_v40 = vmul.f32 %v3573_v19, %v1843_v26 }
 0x247   : > { %v1888_v42 = vadd.f32 %v3579_v59, %v1868_v40 }
 0x248   : > { %v1795_v54 = vpop.f32.mrf.mxu2 }
 0x249   : > { %v1796_v48 = vadd.f32 %v1795_v54, %v1746_v32  ;;  %v1904_v62 = vmax.f32 %v1888_v42, 0.0 }
 0x24a   : > { %v1749_v5 = vpop.f32.mrf.mxu1 }
 0x24b   : > { %v1845_v51 = vadd.f32 %v1844_v30, %v1796_v48 }
 0x24d   : > { %v1869_v28 = vmul.f32 %v3573_v19, %v1845_v51 }
 0x24f   : > { %v1889_v6 = vadd.f32 %v3579_v59, %v1869_v28 }
 0x250   : > { %v1798_v45 = vpop.f32.mrf.mxu2 }
 0x251   : > { %v1799_v13 = vadd.f32 %v1798_v45, %v1749_v5  ;;  %v1905_v10 = vmax.f32 %v1889_v6, 0.0 }
 0x252   : > { %v1751_v8 = vpop.f32.mrf.mxu1 }
 0x253   : > { %v3599_v41 = vpack.c.bf16 %v1905_v10, %v1904_v62  ;;  %v1848_v3 = vadd.f32 %v1847_v38, %v1799_v13 }
 0x255   : > { %v1870_v2 = vmul.f32 %v3573_v19, %v1848_v3 }
 0x257   : > { %v1890_v27 = vadd.f32 %v3579_v59, %v1870_v2 }
 0x258   : > { %v1800_v37 = vpop.f32.mrf.mxu2 }
 0x259   : > { %v1801_v39 = vadd.f32 %v1800_v37, %v1751_v8  ;;  %v1906_v24 = vmax.f32 %v1890_v27, 0.0  ;;  %v2716_v27 = vld [vmem:[%s2917_s16 + $0x10] sm:$0xff] }
 0x25a   : > { %v1812_v7 = vpop.f32.mrf.mxu1 }
 0x25b   : > { %v1850_v44 = vadd.f32 %v1849_v9, %v1801_v39  ;;  %v1813_v17 = vadd.f32 %v1812_v7, %v3543_v61  ;;  %v2715_v39 = vld [vmem:[%s2917_s16 + $0x8] sm:$0xff] }
 0x25d   : > { %v1871_v58 = vmul.f32 %v3573_v19, %v1850_v44  ;;  %v1856_v31 = vmul.f32 %v3573_v19, %v1813_v17 }
 0x25f   : > { %v1891_v4 = vadd.f32 %v3579_v59, %v1871_v58  ;;  %v1876_v14 = vadd.f32 %v3579_v59, %v1856_v31 }
 0x260   : > { %v1817_v35 = vpop.f32.mrf.mxu2 }
 0x261   : > { %v1907_v60 = vmax.f32 %v1891_v4, 0.0  ;;  %v1818_v23 = vadd.f32 %v1817_v35, %v3551_v57  ;;  %v1892_v21 = vmax.f32 %v1876_v14, 0.0 }
 0x262   : > { %v1814_v22 = vpop.f32.mrf.mxu1 }
 0x263   : > { %v1815_v0 = vadd.f32 %v1814_v22, %v3545_v53  ;;  %v1915_v29 = vpack.c.bf16 %v1907_v60, %v1906_v24  ;;  %v1858_v61 = vmul.f32 %v3573_v19, %v1818_v23  ;;  %v2717_v22 = vld [vmem:[%s2917_s16 + $0x18] sm:$0xff] }
 0x265   : > { %v1857_v15 = vmul.f32 %v3573_v19, %v1815_v0  ;;  %v1878_v49 = vadd.f32 %v3579_v59, %v1858_v61  ;;  %v2718_v61 = vld [vmem:[%s2917_s16 + $0x20] sm:$0xff] }
 0x267   : > { %v1877_v18 = vadd.f32 %v3579_v59, %v1857_v15  ;;  %v1894_v47 = vmax.f32 %v1878_v49, 0.0  ;;  %v2719_v49 = vld [vmem:[%s2917_s16 + $0x28] sm:$0xff] }
 0x268   : > { %v1819_v16 = vpop.f32.mrf.mxu2 }
 0x269   : > { %v1893_v33 = vmax.f32 %v1877_v18, 0.0  ;;  %v1820_v20 = vadd.f32 %v1819_v16, %v3553_v63 }
 0x26b   : > { %v1908_v46 = vpack.c.bf16 %v1893_v33, %v1892_v21  ;;  %v1859_v57 = vmul.f32 %v3573_v19, %v1820_v20 }
 0x26d   : > { %v1879_v53 = vadd.f32 %v3579_v59, %v1859_v57  ;;  %2383 = vmatmul.msk.bf16.vlgmr.msrb.gmra.mxu3 %vm1286_vm7, %v1908_v46 }
 0x26f   : > { %v1895_v34 = vmax.f32 %v1879_v53, 0.0 }
 0x270   : > { %v1822_v52 = vpop.f32.mrf.mxu2 }
 0x271   : > { %v1909_v43 = vpack.c.bf16 %v1895_v34, %v1894_v47  ;;  %v1823_v25 = vadd.f32 %v1822_v52, %v3559_v11  ;;  %v2720_v52 = vld [vmem:[%s2917_s16 + $0x30] sm:$0xff] }
 0x273   : > { %v1860_v36 = vmul.f32 %v3573_v19, %v1823_v25 }
 0x275   : > { %v1880_v26 = vadd.f32 %v3579_v59, %v1860_v36 }
 0x277   : > { %v1896_v40 = vmax.f32 %v1880_v26, 0.0  ;;  %v2721_v26 = vld [vmem:[%s2917_s16 + $0x38] sm:$0xff] }
 0x278   : > { %v1824_v32 = vpop.f32.mrf.mxu2 }
 0x279   : > { %v1825_v63 = vadd.f32 %v1824_v32, %v3561_v12 }
 0x27b   : > { %v1861_v30 = vmul.f32 %v3573_v19, %v1825_v63 }
 0x27d   : > { %v1881_v54 = vadd.f32 %v3579_v59, %v1861_v30  ;;  %2384 = vmatmul.msk.bf16.gmra.mxu3 %vm1286_vm7, %v1909_v43 }
 0x27f   : > { %v1897_v48 = vmax.f32 %v1881_v54, 0.0 }
 0x280   : > { %v1827_v5 = vpop.f32.mrf.mxu2 }
 0x281   : > { %v1910_v51 = vpack.c.bf16 %v1897_v48, %v1896_v40  ;;  %v1828_v28 = vadd.f32 %v1827_v5, %v3566_v50  ;;  %v3643_v50 = vld [vmem:[%s3746_s10] ss:$0 sm:$0xff] }
 0x283   : > { %v1862_v11 = vmul.f32 %v3573_v19, %v1828_v28 }
 0x285   : > { %v1882_v12 = vadd.f32 %v3579_v59, %v1862_v11 }
 0x287   : > { %v1898_v13 = vmax.f32 %v1882_v12, 0.0 }
 0x288   : > { %v1829_v42 = vpop.f32.mrf.mxu2 }
 0x289   : > { %v1830_v6 = vadd.f32 %v1829_v42, %v3568_v55  ;;  %v3648_v55 = vld [vmem:[%s3747_s11] ss:$0 sm:$0xff] }
 0x28b   : > { %v1863_v38 = vmul.f32 %v3573_v19, %v1830_v6 }
 0x28d   : > { %v1883_v45 = vadd.f32 %v3579_v59, %v1863_v38  ;;  %2385 = vmatmul.msk.bf16.gmra.mxu3 %vm1286_vm7, %v1910_v51  ;;  %v2722_v51 = vld [vmem:[%s2917_s16 + $0x40] sm:$0xff]  ;;  %v2723_v38 = vld [vmem:[%s2917_s16 + $0x48] sm:$0xff] }
 0x28f   : > { %v1899_v62 = vmax.f32 %v1883_v45, 0.0 }
 0x291   : > { %v1911_v10 = vpack.c.bf16 %v1899_v62, %v1898_v13 }
 0x29d   : > { %2386 = vmatmul.msk.bf16.gmra.mxu3 %vm1286_vm7, %v1911_v10 }
 0x2ad   : > { %2387 = vmatmul.msk.bf16.gmra.mxu3 %vm1286_vm7, %v3587_v1 }
 0x2bd   : > { %2388 = vmatmul.msk.bf16.gmra.mxu3 %vm1286_vm7, %v3593_v56  ;;  %v2714_v56 = vld [vmem:[%s2917_s16] sm:$0xff] }
 0x2cd   : > { %2389 = vmatmul.msk.bf16.gmra.mxu3 %vm1286_vm7, %v3599_v41 }
 0x2dd   : > { %2390 = vmatmul.msk.bf16.gmra.mxu3 %vm1286_vm7, %v1915_v29 }
 0x2f0   : > { %v1965_v19 = vpop.f32.mrf.mxu3 }
 0x2f1   : > { %v2009_v59 = vmul.f32 %v3643_v50, %v1965_v19 }
 0x2f3   : > { %v2029_v1 = vadd.f32 %v3648_v55, %v2009_v59  ;;  %v2724_v59 = vld [vmem:[%s2917_s16 + $0x50] sm:$0xff] }
 0x2f5   : > { %v2045_v8 = vadd.f32 %v2714_v56, %v2029_v1 }
 0x2f7   : > { %v2061_v41 = vmax.f32 %v2045_v8, 0.0 }
 0x2f8   : > { %v1967_v3 = vpop.f32.mrf.mxu3 }
 0x2f9   : > { %2077 = vst [vmem:[%s3658_s15] sm:$0xff] %v2061_v41  ;;  %v2010_v37 = vmul.f32 %v3643_v50, %v1967_v3 }
 0x2fb   : > { %v2030_v2 = vadd.f32 %v3648_v55, %v2010_v37  ;;  %v2725_v37 = vld [vmem:[%s2917_s16 + $0x58] sm:$0xff] }
 0x2fd   : > { %v2046_v9 = vadd.f32 %v2715_v39, %v2030_v2 }
 0x2ff   : > { %v2062_v7 = vmax.f32 %v2046_v9, 0.0 }
 0x300   : > { %v1970_v44 = vpop.f32.mrf.mxu3 }
 0x301   : > { %2078 = vst [vmem:[%s3658_s15 + $0x8] sm:$0xff] %v2062_v7  ;;  %v2011_v58 = vmul.f32 %v3643_v50, %v1970_v44 }
 0x303   : > { %v2031_v17 = vadd.f32 %v3648_v55, %v2011_v58  ;;  %v2726_v58 = vld [vmem:[%s2917_s16 + $0x60] sm:$0xff] }
 0x305   : > { %v2047_v4 = vadd.f32 %v2716_v27, %v2031_v17 }
 0x307   : > { %v2063_v35 = vmax.f32 %v2047_v4, 0.0 }
 0x308   : > { %v1972_v31 = vpop.f32.mrf.mxu3 }
 0x309   : > { %2079 = vst [vmem:[%s3658_s15 + $0x10] sm:$0xff] %v2063_v35  ;;  %v2012_v24 = vmul.f32 %v3643_v50, %v1972_v31 }
 0x30b   : > { %v2032_v60 = vadd.f32 %v3648_v55, %v2012_v24  ;;  %v2727_v24 = vld [vmem:[%s2917_s16 + $0x68] sm:$0xff] }
 0x30d   : > { %v2048_v23 = vadd.f32 %v2717_v22, %v2032_v60 }
 0x30f   : > { %v2064_v0 = vmax.f32 %v2048_v23, 0.0 }
 0x310   : > { %v1975_v29 = vpop.f32.mrf.mxu3 }
 0x311   : > { %2080 = vst [vmem:[%s3658_s15 + $0x18] sm:$0xff] %v2064_v0  ;;  %v2013_v14 = vmul.f32 %v3643_v50, %v1975_v29 }
 0x313   : > { %v2033_v15 = vadd.f32 %v3648_v55, %v2013_v14  ;;  %v2728_v14 = vld [vmem:[%s2917_s16 + $0x70] sm:$0xff] }
 0x315   : > { %v2049_v18 = vadd.f32 %v2718_v61, %v2033_v15 }
 0x317   : > { %v2065_v16 = vmax.f32 %v2049_v18, 0.0 }
 0x318   : > { %v1977_v21 = vpop.f32.mrf.mxu3 }
 0x319   : > { %2081 = vst [vmem:[%s3658_s15 + $0x20] sm:$0xff] %v2065_v16  ;;  %v2014_v33 = vmul.f32 %v3643_v50, %v1977_v21 }
 0x31b   : > { %v2034_v20 = vadd.f32 %v3648_v55, %v2014_v33  ;;  %v2729_v33 = vld [vmem:[%s2917_s16 + $0x78] sm:$0xff] }
 0x31d   : > { %v2050_v46 = vadd.f32 %v2719_v49, %v2034_v20 }
 0x31f   : > { %v2066_v57 = vmax.f32 %v2050_v46, 0.0 }
 0x320   : > { %v1980_v53 = vpop.f32.mrf.mxu3 }
 0x321   : > { %2082 = vst [vmem:[%s3658_s15 + $0x28] sm:$0xff] %v2066_v57  ;;  %v2015_v47 = vmul.f32 %v3643_v50, %v1980_v53 }
 0x323   : > { %v2035_v34 = vadd.f32 %v3648_v55, %v2015_v47 }
 0x325   : > { %v2051_v43 = vadd.f32 %v2720_v52, %v2035_v34 }
 0x327   : > { %v2067_v25 = vmax.f32 %v2051_v43, 0.0 }
 0x328   : > { %v1982_v36 = vpop.f32.mrf.mxu3 }
 0x329   : > { %2083 = vst [vmem:[%s3658_s15 + $0x30] sm:$0xff] %v2067_v25  ;;  %v2016_v32 = vmul.f32 %v3643_v50, %v1982_v36 }
 0x32b   : > { %v2036_v63 = vadd.f32 %v3648_v55, %v2016_v32 }
 0x32d   : > { %v2052_v30 = vadd.f32 %v2721_v26, %v2036_v63 }
 0x32f   : > { %v2068_v54 = vmax.f32 %v2052_v30, 0.0 }
 0x330   : > { %v1985_v40 = vpop.f32.mrf.mxu3 }
 0x331   : > { %2084 = vst [vmem:[%s3658_s15 + $0x38] sm:$0xff] %v2068_v54  ;;  %v2017_v48 = vmul.f32 %v3643_v50, %v1985_v40 }
 0x333   : > { %v2037_v5 = vadd.f32 %v3648_v55, %v2017_v48 }
 0x335   : > { %v2053_v28 = vadd.f32 %v2722_v51, %v2037_v5 }
 0x337   : > { %v2069_v11 = vmax.f32 %v2053_v28, 0.0 }
 0x338   : > { %v1987_v42 = vpop.f32.mrf.mxu3 }
 0x339   : > { %2085 = vst [vmem:[%s3658_s15 + $0x40] sm:$0xff] %v2069_v11  ;;  %v2018_v6 = vmul.f32 %v3643_v50, %v1987_v42 }
 0x33b   : > { %v2038_v12 = vadd.f32 %v3648_v55, %v2018_v6 }
 0x33d   : > { %v2054_v45 = vadd.f32 %v2723_v38, %v2038_v12 }
 0x33f   : > { %v2070_v13 = vmax.f32 %v2054_v45, 0.0 }
 0x340   : > { %v1990_v62 = vpop.f32.mrf.mxu3 }
 0x341   : > { %2086 = vst [vmem:[%s3658_s15 + $0x48] sm:$0xff] %v2070_v13  ;;  %v2019_v10 = vmul.f32 %v3643_v50, %v1990_v62 }
 0x343   : > { %v2039_v19 = vadd.f32 %v3648_v55, %v2019_v10 }
 0x345   : > { %v2055_v1 = vadd.f32 %v2724_v59, %v2039_v19 }
 0x347   : > { %v2071_v56 = vmax.f32 %v2055_v1, 0.0 }
 0x348   : > { %v1992_v8 = vpop.f32.mrf.mxu3 }
 0x349   : > { %2087 = vst [vmem:[%s3658_s15 + $0x50] sm:$0xff] %v2071_v56  ;;  %v2020_v41 = vmul.f32 %v3643_v50, %v1992_v8 }
 0x34b   : > { %v2040_v3 = vadd.f32 %v3648_v55, %v2020_v41 }
 0x34d   : > { %v2056_v2 = vadd.f32 %v2725_v37, %v2040_v3 }
 0x34f   : > { %v2072_v39 = vmax.f32 %v2056_v2, 0.0 }
 0x350   : > { %v1995_v9 = vpop.f32.mrf.mxu3 }
 0x351   : > { %2088 = vst [vmem:[%s3658_s15 + $0x58] sm:$0xff] %v2072_v39  ;;  %v2021_v7 = vmul.f32 %v3643_v50, %v1995_v9 }
 0x353   : > { %v2041_v44 = vadd.f32 %v3648_v55, %v2021_v7 }
 0x355   : > { %v2057_v17 = vadd.f32 %v2726_v58, %v2041_v44 }
 0x357   : > { %v2073_v27 = vmax.f32 %v2057_v17, 0.0 }
 0x358   : > { %v1997_v4 = vpop.f32.mrf.mxu3 }
 0x359   : > { %2089 = vst [vmem:[%s3658_s15 + $0x60] sm:$0xff] %v2073_v27  ;;  %v2022_v35 = vmul.f32 %v3643_v50, %v1997_v4 }
 0x35b   : > { %v2042_v31 = vadd.f32 %v3648_v55, %v2022_v35 }
 0x35d   : > { %v2058_v60 = vadd.f32 %v2727_v24, %v2042_v31 }
 0x35f   : > { %v2074_v22 = vmax.f32 %v2058_v60, 0.0 }
 0x360   : > { %v2000_v23 = vpop.f32.mrf.mxu3 }
 0x361   : > { %2090 = vst [vmem:[%s3658_s15 + $0x68] sm:$0xff] %v2074_v22  ;;  %v2023_v0 = vmul.f32 %v3643_v50, %v2000_v23 }
 0x363   : > { %v2043_v29 = vadd.f32 %v3648_v55, %v2023_v0 }
 0x365   : > { %v2059_v15 = vadd.f32 %v2728_v14, %v2043_v29 }
 0x367   : > { %v2075_v61 = vmax.f32 %v2059_v15, 0.0 }
 0x368   : > { %v2002_v18 = vpop.f32.mrf.mxu3 }
 0x369   : > { %2091 = vst [vmem:[%s3658_s15 + $0x70] sm:$0xff] %v2075_v61  ;;  %v2024_v16 = vmul.f32 %v3643_v50, %v2002_v18 }
 0x36b   : > { %v2044_v21 = vadd.f32 %v3648_v55, %v2024_v16 }
 0x36d   : > { %v2060_v20 = vadd.f32 %v2729_v33, %v2044_v21 }
 0x36f   : > { %v2076_v49 = vmax.f32 %v2060_v20, 0.0 }
 0x371   : > { %2092 = vst [vmem:[%s3658_s15 + $0x78] sm:$0xff] %v2076_v49 }
 0x372 PF: > { %s22_s25 = sadd.s32 1, %s2768_s25   ;;  %s3776_s17 = sld [smem:[#allocation2_spill]] }
 0x373   : > { %p19_p8 = scmp.ge.s32.totalorder %s22_s25, 6   ;;  %s3777_s21 = smov %s2760_s23 }
 0x374   : > { %s3778_s22 = smov %s2764_s24  ;;  %s3779_s23 = smov %s3782_s26 }
 0x375   :  { %21 = sbr.rel (!%p19_p8) target bundleno = 3 (0x3), region = 104 }
 0x378   : > { %s3780_s24 = smov %s3776_s17 }

</bundles_post_ra>
